<compile_context>
chip_gen: v7x
topology: tpu7x:2x2x1
jax: 0.10.0
libtpu: 0.0.40
codegen_flags: <defaults>
</compile_context>

<pallas_src>
import functools

import jax
import jax.numpy as jnp
from jax.experimental import pallas as pl
from jax.experimental.pallas import tpu as pltpu


# ----------------------------- configuration -----------------------------
IN_DIM = 4
OUT_DIM = 3
HIDDEN_DIM = 32
HIDDEN_DEPTH = 2
MOD_TOTAL = 2 * HIDDEN_DIM * HIDDEN_DEPTH   # scale + shift for every hidden layer
MAX_ROW_TILE = 4096                         # rows per grid step (upper bound)


# --------------------------- row-tile selection ----------------------------
def _pick_row_tile(n, max_tile=MAX_ROW_TILE):
    """Rows per grid step.

    As large as possible (big DMA bursts on the 128-wide mod stream, amortized
    ~0.35us per-step overhead) while keeping an even number (>= 2) of grid
    steps when n allows, so the 'parallel' row axis shards across both v7x
    TensorCores. Always a multiple of 8 (sublane constraint) unless a single
    tile equal to the full row count is unavoidable.
    """
    if n <= 8:
        return max(n, 1)                       # single tile == full array dim
    pairs = -(-n // (2 * max_tile))            # ceil
    num_tiles = 2 * pairs                      # even step count
    tile = -(-n // num_tiles)                  # ceil rows per tile
    tile = -(-tile // 8) * 8                   # round up to sublane multiple
    return min(tile, max_tile)


# ------------------------------- kernel ----------------------------------
def _lmmlp_kernel(hidden_depth, hidden_dim, mm_dtype, x_ref, mod_ref, *refs):
    """refs = [w0, b0, w1, b1, ..., w_out, b_out, o_ref].

    Matmul operands are kept in `mm_dtype` (the weights' dtype, e.g. bf16 for
    native MXU on v6e/v7x); accumulation and FiLM math are f32.
    """
    o_ref = refs[-1]
    wb = refs[:-1]

    mid = hidden_dim * hidden_depth
    mod = mod_ref[...].astype(jnp.float32)     # FiLM math in f32
    h = x_ref[...].astype(mm_dtype)

    # hidden layers: Linear -> FiLM modulation -> ReLU
    for d in range(hidden_depth):
        w = wb[2 * d][...]
        b = wb[2 * d + 1][...].astype(jnp.float32)
        h = jnp.dot(h, w, preferred_element_type=jnp.float32) + b
        scale = mod[:, d * hidden_dim:(d + 1) * hidden_dim] + 1.0
        shift = mod[:, mid + d * hidden_dim: mid + (d + 1) * hidden_dim]
        h = jnp.maximum(h * scale + shift, 0.0).astype(mm_dtype)

    # final linear (no modulation, no ReLU)
    w_out = wb[2 * hidden_depth][...]
    b_out = wb[2 * hidden_depth + 1][...].astype(jnp.float32)
    out = jnp.dot(h, w_out, preferred_element_type=jnp.float32) + b_out
    o_ref[...] = out.astype(o_ref.dtype)


# ------------------------------- wrapper ----------------------------------
def lmmlp_forward(x, mod, params, *, hidden_depth=HIDDEN_DEPTH,
                  hidden_dim=HIDDEN_DIM, out_dim=OUT_DIM,
                  max_row_tile=MAX_ROW_TILE, mod_buffers=2):
    """x: (..., in_dim); mod: (..., 2*hidden_dim*hidden_depth).

    x / mod are streamed in the dtype the caller provides (no wrapper cast —
    bf16 streaming only pays when the producer already emits bf16). Matmuls
    run in the weights' dtype; FiLM math and accumulation are f32; the output
    dtype matches x.

    mod_buffers: set to 3 on v7x only after a profile shows exposed DMA on the
    mod stream at grid-step boundaries (default 2 = standard double-buffering).
    """
    lead_shape = x.shape[:-1]
    in_dim = x.shape[-1]
    out_dtype = x.dtype

    x2 = x.reshape(-1, in_dim)
    mod2 = mod.reshape(-1, mod.shape[-1])
    mod_total = mod2.shape[-1]
    n = x2.shape[0]

    # Ragged row grid — no host-side padding; Pallas masks the final block.
    row_tile = _pick_row_tile(n, max_row_tile)
    num_tiles = pl.cdiv(n, row_tile)
    grid = (num_tiles,)

    mod_spec_kwargs = {}
    if mod_buffers > 2 and num_tiles > 2:
        # v7x: extra buffer on the dominant stream hides DMA issue latency.
        mod_spec_kwargs["pipeline_mode"] = pl.Buffered(mod_buffers)

    in_specs = [
        pl.BlockSpec((row_tile, in_dim), lambda i: (i, 0)),
        pl.BlockSpec((row_tile, mod_total), lambda i: (i, 0), **mod_spec_kwargs),
    ]

    flat_params = []
    param_bytes = 0
    for (w, b) in params:
        flat_params.append(w)
        flat_params.append(b.reshape(1, -1))
        in_specs.append(pl.BlockSpec(w.shape, lambda i: (0, 0)))
        in_specs.append(pl.BlockSpec((1, b.shape[-1]), lambda i: (0, 0)))
        param_bytes += (w.size + b.size) * jnp.dtype(w.dtype).itemsize
    mm_dtype = params[0][0].dtype

    # Advisory cost estimate so XLA can overlap this call with the mod producer.
    flops = 2 * n * (in_dim * hidden_dim
                     + hidden_dim * hidden_dim * max(hidden_depth - 1, 0)
                     + hidden_dim * out_dim)
    bytes_accessed = (n * in_dim * jnp.dtype(x2.dtype).itemsize
                      + n * mod_total * jnp.dtype(mod2.dtype).itemsize
                      + n * out_dim * jnp.dtype(out_dtype).itemsize
                      + param_bytes)
    cost = pl.CostEstimate(flops=flops, transcendentals=0,
                           bytes_accessed=bytes_accessed)

    # Note: no vmem_limit_bytes override — at <= 4096-row tiles the
    # double-buffered x/mod/out tiles plus resident params are ~6 MiB,
    # well within every chip's default scoped-VMEM limit.
    kernel = functools.partial(_lmmlp_kernel, hidden_depth, hidden_dim, mm_dtype)

    out2 = pl.pallas_call(
        kernel,
        out_shape=jax.ShapeDtypeStruct((n, out_dim), out_dtype),
        grid_spec=pltpu.PrefetchScalarGridSpec(
            num_scalar_prefetch=0,
            grid=grid,
            in_specs=in_specs,
            out_specs=pl.BlockSpec((row_tile, out_dim), lambda i: (i, 0)),
        ),
        compiler_params=pltpu.CompilerParams(
            dimension_semantics=("parallel",)),
        cost_estimate=cost,
    )(x2, mod2, *flat_params)

    return out2.reshape(*lead_shape, out_dim)


# ----------------------- deterministic parameter init ----------------------
def init_params(key, in_dim, hidden_dim, out_dim, hidden_depth):
    """nn.Linear-style (uniform) init, deterministic. W stored as (in, out)."""
    params = []
    lastv = in_dim
    dims = [hidden_dim] * hidden_depth + [out_dim]
    for d_out in dims:
        key, kw, kb = jax.random.split(key, 3)
        bound = 1.0 / (lastv ** 0.5)
        w = jax.random.uniform(kw, (lastv, d_out), jnp.float32, -bound, bound)
        b = jax.random.uniform(kb, (d_out,), jnp.float32, -bound, bound)
        params.append((w, b))
        lastv = d_out
    return params


# ------------------------------ reference ---------------------------------
def lmmlp_reference(x, mod, params, hidden_depth, hidden_dim):
    lead = x.shape[:-1]
    h = x.reshape(-1, x.shape[-1])
    m = mod.reshape(-1, mod.shape[-1])
    mid = hidden_dim * hidden_depth
    for d in range(hidden_depth):
        w, b = params[d]
        h = h @ w + b
        h = h * (m[:, d * hidden_dim:(d + 1) * hidden_dim] + 1.0)
        h = h + m[:, mid + d * hidden_dim: mid + (d + 1) * hidden_dim]
        h = jnp.maximum(h, 0.0)
    w, b = params[-1]
    h = h @ w + b
    return h.reshape(*lead, -1)


# --------------------------------- main ------------------------------------
if __name__ == "__main__":
    key = jax.random.PRNGKey(0)
    k_x, k_mod, k_p = jax.random.split(key, 3)

    batch, seq = 2, 300        # N = 600 rows -> two ragged tiles (304 + 296), no host pad
    x = jax.random.normal(k_x, (batch, seq, IN_DIM), jnp.float32)
    mod = jax.random.normal(k_mod, (batch, seq, MOD_TOTAL), jnp.float32)
    params = init_params(k_p, IN_DIM, HIDDEN_DIM, OUT_DIM, HIDDEN_DEPTH)

    ref = lmmlp_reference(x, mod, params, HIDDEN_DEPTH, HIDDEN_DIM)

    # f32 weights: exact path, tight tolerance.
    out = lmmlp_forward(x, mod, params)
    out = jax.block_until_ready(out)
    assert out.shape == (batch, seq, OUT_DIM)
    assert jnp.allclose(out, ref, atol=1e-5, rtol=1e-5), "mismatch vs reference (f32)"

    # bf16 weights -> native MXU bf16 matmuls (v6e/v7x); FiLM math stays f32.
    params_bf16 = [(w.astype(jnp.bfloat16), b.astype(jnp.bfloat16)) for (w, b) in params]
    out_bf16 = lmmlp_forward(x, mod, params_bf16)
    out_bf16 = jax.block_until_ready(out_bf16)
    assert out_bf16.shape == (batch, seq, OUT_DIM)
    assert jnp.allclose(out_bf16, ref, atol=0.3, rtol=0.1), "mismatch vs reference (bf16 weights)"

    print("KERNEL_OK")
</pallas_src>

<mosaic_0001>
module attributes {stable_mosaic.version = 11 : i64} {
  func.func @_lmmlp_kernel(%arg0: i32, %arg1: memref<304x4xf32, #tpu.memory_space<vmem>>, %arg2: memref<304x128xf32, #tpu.memory_space<vmem>>, %arg3: memref<4x32xf32, #tpu.memory_space<vmem>>, %arg4: memref<1x32xf32, #tpu.memory_space<vmem>>, %arg5: memref<32x32xf32, #tpu.memory_space<vmem>>, %arg6: memref<1x32xf32, #tpu.memory_space<vmem>>, %arg7: memref<32x3xf32, #tpu.memory_space<vmem>>, %arg8: memref<1x3xf32, #tpu.memory_space<vmem>>, %arg9: memref<304x3xf32, #tpu.memory_space<vmem>>) attributes {dimension_semantics = [#tpu.dimension_semantics<parallel>], iteration_bounds = array<i64: 2>, scalar_prefetch = 0 : i64, scratch_operands = 0 : i64, tpu.core_type = #tpu.core_type<tc>, window_params = [{transform_indices = @transform_0, window_bounds = array<i64: 304, 4>}, {transform_indices = @transform_1, window_bounds = array<i64: 304, 128>}, {pipeline_mode = #tpu.pipeline_mode<synchronous>, transform_indices = @transform_2, window_bounds = array<i64: 4, 32>}, {pipeline_mode = #tpu.pipeline_mode<synchronous>, transform_indices = @transform_3, window_bounds = array<i64: 1, 32>}, {pipeline_mode = #tpu.pipeline_mode<synchronous>, transform_indices = @transform_4, window_bounds = array<i64: 32, 32>}, {pipeline_mode = #tpu.pipeline_mode<synchronous>, transform_indices = @transform_5, window_bounds = array<i64: 1, 32>}, {pipeline_mode = #tpu.pipeline_mode<synchronous>, transform_indices = @transform_6, window_bounds = array<i64: 32, 3>}, {pipeline_mode = #tpu.pipeline_mode<synchronous>, transform_indices = @transform_7, window_bounds = array<i64: 1, 3>}, {transform_indices = @transform_8, window_bounds = array<i64: 304, 3>}]} {
    %c0 = arith.constant 0 : index
    %c0_0 = arith.constant 0 : index
    %0 = vector.load %arg2[%c0, %c0_0] : memref<304x128xf32, #tpu.memory_space<vmem>>, vector<304x128xf32>
    %c0_1 = arith.constant 0 : index
    %c0_2 = arith.constant 0 : index
    %1 = vector.load %arg1[%c0_1, %c0_2] : memref<304x4xf32, #tpu.memory_space<vmem>>, vector<304x4xf32>
    %c0_3 = arith.constant 0 : index
    %c0_4 = arith.constant 0 : index
    %2 = vector.load %arg3[%c0_3, %c0_4] : memref<4x32xf32, #tpu.memory_space<vmem>>, vector<4x32xf32>
    %c0_5 = arith.constant 0 : index
    %c0_6 = arith.constant 0 : index
    %3 = vector.load %arg4[%c0_5, %c0_6] : memref<1x32xf32, #tpu.memory_space<vmem>>, vector<1x32xf32>
    %cst = arith.constant dense<0.000000e+00> : vector<304x32xf32>
    %4 = tpu.matmul %1, %2, %cst {dimension_numbers = #tpu.dot_dimension_numbers<[1], [0], [0], [1], [0, 0, 1, 1], [], []>} : vector<304x4xf32>, vector<4x32xf32>, vector<304x32xf32> -> vector<304x32xf32>
    %5 = vector.broadcast %3 : vector<1x32xf32> to vector<304x32xf32>
    %6 = arith.addf %4, %5 : vector<304x32xf32>
    %7 = vector.extract_strided_slice %0 {offsets = [0, 0], sizes = [304, 32], strides = [1, 1]} : vector<304x128xf32> to vector<304x32xf32>
    %cst_7 = arith.constant 1.000000e+00 : f32
    %8 = vector.broadcast %cst_7 : f32 to vector<304x32xf32>
    %9 = arith.addf %7, %8 : vector<304x32xf32>
    %10 = vector.extract_strided_slice %0 {offsets = [0, 64], sizes = [304, 32], strides = [1, 1]} : vector<304x128xf32> to vector<304x32xf32>
    %11 = arith.mulf %6, %9 : vector<304x32xf32>
    %12 = arith.addf %11, %10 : vector<304x32xf32>
    %cst_8 = arith.constant 0.000000e+00 : f32
    %13 = vector.broadcast %cst_8 : f32 to vector<304x32xf32>
    %14 = arith.maximumf %12, %13 : vector<304x32xf32>
    %c0_9 = arith.constant 0 : index
    %c0_10 = arith.constant 0 : index
    %15 = vector.load %arg5[%c0_9, %c0_10] : memref<32x32xf32, #tpu.memory_space<vmem>>, vector<32x32xf32>
    %c0_11 = arith.constant 0 : index
    %c0_12 = arith.constant 0 : index
    %16 = vector.load %arg6[%c0_11, %c0_12] : memref<1x32xf32, #tpu.memory_space<vmem>>, vector<1x32xf32>
    %cst_13 = arith.constant dense<0.000000e+00> : vector<304x32xf32>
    %17 = tpu.matmul %14, %15, %cst_13 {dimension_numbers = #tpu.dot_dimension_numbers<[1], [0], [0], [1], [0, 0, 1, 1], [], []>} : vector<304x32xf32>, vector<32x32xf32>, vector<304x32xf32> -> vector<304x32xf32>
    %18 = vector.broadcast %16 : vector<1x32xf32> to vector<304x32xf32>
    %19 = arith.addf %17, %18 : vector<304x32xf32>
    %20 = vector.extract_strided_slice %0 {offsets = [0, 32], sizes = [304, 32], strides = [1, 1]} : vector<304x128xf32> to vector<304x32xf32>
    %cst_14 = arith.constant 1.000000e+00 : f32
    %21 = vector.broadcast %cst_14 : f32 to vector<304x32xf32>
    %22 = arith.addf %20, %21 : vector<304x32xf32>
    %23 = vector.extract_strided_slice %0 {offsets = [0, 96], sizes = [304, 32], strides = [1, 1]} : vector<304x128xf32> to vector<304x32xf32>
    %24 = arith.mulf %19, %22 : vector<304x32xf32>
    %25 = arith.addf %24, %23 : vector<304x32xf32>
    %cst_15 = arith.constant 0.000000e+00 : f32
    %26 = vector.broadcast %cst_15 : f32 to vector<304x32xf32>
    %27 = arith.maximumf %25, %26 : vector<304x32xf32>
    %c0_16 = arith.constant 0 : index
    %c0_17 = arith.constant 0 : index
    %28 = vector.load %arg7[%c0_16, %c0_17] : memref<32x3xf32, #tpu.memory_space<vmem>>, vector<32x3xf32>
    %c0_18 = arith.constant 0 : index
    %c0_19 = arith.constant 0 : index
    %29 = vector.load %arg8[%c0_18, %c0_19] : memref<1x3xf32, #tpu.memory_space<vmem>>, vector<1x3xf32>
    %cst_20 = arith.constant dense<0.000000e+00> : vector<304x3xf32>
    %30 = tpu.matmul %27, %28, %cst_20 {dimension_numbers = #tpu.dot_dimension_numbers<[1], [0], [0], [1], [0, 0, 1, 1], [], []>} : vector<304x32xf32>, vector<32x3xf32>, vector<304x3xf32> -> vector<304x3xf32>
    %31 = vector.broadcast %29 : vector<1x3xf32> to vector<304x3xf32>
    %32 = arith.addf %30, %31 : vector<304x3xf32>
    %c0_21 = arith.constant 0 : index
    %c0_22 = arith.constant 0 : index
    %33 = vector.load %arg9[%c0_21, %c0_22] : memref<304x3xf32, #tpu.memory_space<vmem>>, vector<304x3xf32>
    tpu.vector_store %arg9[%c0_21, %c0_22], %32 {strides = array<i32>} : memref<304x3xf32, #tpu.memory_space<vmem>>, vector<304x3xf32>,
    return
  }
  func.func @transform_0(%arg0: i32) -> (i32, i32) {
    %c0_i32 = arith.constant 0 : i32
    %c0_i32_0 = arith.constant 0 : i32
    return %arg0, %c0_i32 : i32, i32
  }
  func.func @transform_1(%arg0: i32) -> (i32, i32) {
    %c0_i32 = arith.constant 0 : i32
    %c0_i32_0 = arith.constant 0 : i32
    return %arg0, %c0_i32 : i32, i32
  }
  func.func @transform_2(%arg0: i32) -> (i32, i32) {
    %c0_i32 = arith.constant 0 : i32
    %c0_i32_0 = arith.constant 0 : i32
    %c0_i32_1 = arith.constant 0 : i32
    return %c0_i32, %c0_i32_0 : i32, i32
  }
  func.func @transform_3(%arg0: i32) -> (i32, i32) {
    %c0_i32 = arith.constant 0 : i32
    %c0_i32_0 = arith.constant 0 : i32
    %c0_i32_1 = arith.constant 0 : i32
    return %c0_i32, %c0_i32_0 : i32, i32
  }
  func.func @transform_4(%arg0: i32) -> (i32, i32) {
    %c0_i32 = arith.constant 0 : i32
    %c0_i32_0 = arith.constant 0 : i32
    %c0_i32_1 = arith.constant 0 : i32
    return %c0_i32, %c0_i32_0 : i32, i32
  }
  func.func @transform_5(%arg0: i32) -> (i32, i32) {
    %c0_i32 = arith.constant 0 : i32
    %c0_i32_0 = arith.constant 0 : i32
    %c0_i32_1 = arith.constant 0 : i32
    return %c0_i32, %c0_i32_0 : i32, i32
  }
  func.func @transform_6(%arg0: i32) -> (i32, i32) {
    %c0_i32 = arith.constant 0 : i32
    %c0_i32_0 = arith.constant 0 : i32
    %c0_i32_1 = arith.constant 0 : i32
    return %c0_i32, %c0_i32_0 : i32, i32
  }
  func.func @transform_7(%arg0: i32) -> (i32, i32) {
    %c0_i32 = arith.constant 0 : i32
    %c0_i32_0 = arith.constant 0 : i32
    %c0_i32_1 = arith.constant 0 : i32
    return %c0_i32, %c0_i32_0 : i32, i32
  }
  func.func @transform_8(%arg0: i32) -> (i32, i32) {
    %c0_i32 = arith.constant 0 : i32
    %c0_i32_0 = arith.constant 0 : i32
    return %arg0, %c0_i32 : i32, i32
  }
}

</mosaic_0001>

<bundles_post_ra>
// kernel: tpu_custom_call.1
= control target key start
LH: loop header
LB: loop body
LE: loop exit
PB: predicated region body
PF: predicated region fallthrough
CT: control target
= control target key end

     0   :  { %s3388_s27 = smov 0   ;;  %s3390_s28 = smov 0   ;;  %s4773_s0 = inlined_call_operand.vmem [shape: f32[600,4], index: 0, kind: input, shape index: {}]   ;;  %s4774_s1 = inlined_call_operand.vmem [shape: f32[600,128], index: 1, kind: input, shape index: {}]   ;;  %s4775_s2 = inlined_call_operand.vmem [shape: f32[4,32], index: 2, kind: input, shape index: {}]   ;;  %s4776_s3 = inlined_call_operand.vmem [shape: f32[1,32], index: 3, kind: input, shape index: {}]   ;;  %s4777_s4 = inlined_call_operand.vmem [shape: f32[32,32], index: 4, kind: input, shape index: {}]   ;;  %s4778_s5 = inlined_call_operand.vmem [shape: f32[1,32], index: 5, kind: input, shape index: {}]   ;;  %s4779_s6 = inlined_call_operand.vmem [shape: f32[32,3], index: 6, kind: input, shape index: {}]   ;;  %s4780_s7 = inlined_call_operand.vmem [shape: f32[1,3], index: 7, kind: input, shape index: {}]   ;;  %s4781_s8 = inlined_call_operand.vmem [shape: f32[600,3], index: 8, kind: output, shape index: {}]  }
   0x1   :  { %s3392_s29 = smov 0  }
   0x2 LB: > { %s3401_s30 = sadd.s32 4294967295, %s3306_s29   ;;  %s3403_s9 = sadd.s32 1, %s3306_s29   ;;  %s3306_s29 = sphi %s3392_s29, %s4818_s29   ;;  %s3302_s28 = sphi %s3390_s28, %s4817_s28   ;;  %s3298_s27 = sphi %s3388_s27, %s4816_s27  }
   0x3   : > { %s200_s10 = ssub.s32 %s3306_s29, %s3403_s9  ;;  %s203_s11 = sadd.s32 1, %s3302_s28 }
   0x4   : > { %p201_p0 = scmp.eq.s32.totalorder %s200_s10, 0  ;;  %p213_p1 = scmp.ne.s32.totalorder %s3302_s28, %s3298_s27 }
   0x5   : > { %p214_p2 = scmp.eq.s32.totalorder %s3401_s30, 1  ;;  %p2691_p3 = scmp.ge.s32.totalorder %s3306_s29, 1 }
   0x6   : > { %s3411_s12 = scalar_select %p201_p0, %s3302_s28, %s203_s11  }
   0x7   : > { %p3413_p4 = por %p214_p2, %p213_p1  ;;  %p290_p5 = scmp.lt.s32.totalorder %s3306_s29, 3 }
   0x9   : > { %p291_p6 = pnand %p2691_p3, %p290_p5 }
   0xb   : > { %294 = sbr.rel (%p291_p6) target bundleno = 831 (0x33f), region = 52 }
  0x12   : > { %v445_v0 = vld [vmem:[%s4775_s2] sm:$0xf]  ;;  %vm568_vm0 = vcmask 1043456   ;;  %s3421_s16 = smul.u32 38, %s3401_s30  ;;  %v1132_v2 = vld [vmem:[%s4777_s4 + $0x8] sm:$0xff]  ;;  %vm453_vm1 = vcmask 31744  }
  0x13   : > { %2948 = vmatprep.subr.msk.mxu0 %vm568_vm0, %v445_v0  ;;  %3153 = vmatprep.subr.msk.mxu1 %vm568_vm0, %v445_v0  ;;  %v1131_v1 = vld [vmem:[%s4777_s4] sm:$0xff]  ;;  %v1133_v8 = vld [vmem:[%s4777_s4 + $0x10] sm:$0xff]  ;;  %v1134_v9 = vld [vmem:[%s4777_s4 + $0x18] sm:$0xff]  ;;  %s3340_s18 = smov 64   ;;  %s3341_s19 = smov 96   ;;  %vm1142_vm2 = vcmask 261120  }
  0x14   : > { %2949 = vmatpush3.msk.msra.mxu0 %vm568_vm0, %v445_v0  ;;  %p341_p7 = scmp.lt.s32.totalorder %s3421_s16, 74  ;;  %3154 = vmatpush3.msk.msra.mxu1 %vm568_vm0, %v445_v0  ;;  %v3137_v3 = vpack.c.bf16 %v1132_v2, %v1131_v1  ;;  %v3141_v12 = vpack.c.bf16 %v1134_v9, %v1133_v8  ;;  %s3342_s20 = smov 32   ;;  %vm2272_vm3 = vcmask 23552  }
  0x15   : > { %s2824_s23 = smul.u32 (%p3413_p4), 304, %s3401_s30 }
  0x16   : > { %s342_s21 = scalar_select %p341_p7, %s3421_s16, 74  ;;  %3138 = vmatprep.subr.bf16.mxu1 %v3137_v3 }
  0x17   : > { %s4631_s26 = scalar_lea.vmem (%p3413_p4), %s4781_s8, %s2824_s23  }
  0x18   : > { %s2692_s22 = sshll.u32 %s342_s21, 3 }
  0x19   : > { %s3434_s25 = scalar_lea.vmem %s4773_s0, %s2692_s22  ;;  %s3464_s17 = scalar_lea.vmem %s4774_s1, %s2692_s22 }
  0x1a   : > { %v407_v4 = vld [vmem:[%s3434_s25] sm:$0xff]  ;;  %v408_v5 = vld [vmem:[%s3434_s25 + $0x8] sm:$0xff]  ;;  %v409_v6 = vld [vmem:[%s3434_s25 + $0x10] sm:$0xff] }
  0x1b   : > { %2950 = vmatprep.mubr.msk.f32.mxu0 %vm453_vm1, %v407_v4  ;;  %v410_v7 = vld [vmem:[%s3434_s25 + $0x18] sm:$0xff]  ;;  %v411_v10 = vld [vmem:[%s3434_s25 + $0x20] sm:$0xff]  ;;  %v412_v13 = vld [vmem:[%s3434_s25 + $0x28] sm:$0xff] }
  0x1c   : > { %2951 = vmatmul.mubr.msk.f32.vlgmr.msra.gmra.mrb[0].mxu0 %vm453_vm1, %v408_v5  ;;  %v427_v11 = vld [vmem:[%s3434_s25 + $0xa0] sm:$0xff]  ;;  %v428_v14 = vld [vmem:[%s3434_s25 + $0xa8] sm:$0xff]  ;;  %v429_v15 = vld [vmem:[%s3434_s25 + $0xb0] sm:$0xff] }
  0x1d   : > { %2953 = vmatprep.mubr.msk.f32.mxu0 %vm453_vm1, %v409_v6  ;;  %2980 = vmatprep.mubr.msk.f32.mxu1 %vm453_vm1, %v427_v11  ;;  %v413_v16 = vld [vmem:[%s3434_s25 + $0x30] sm:$0xff]  ;;  %v430_v17 = vld [vmem:[%s3434_s25 + $0xb8] sm:$0xff]  ;;  %v431_v18 = vld [vmem:[%s3434_s25 + $0xc0] sm:$0xff] }
  0x1e   : > { %2981 = vmatmul.mubr.msk.f32.vlgmr.msra.gmra.mrb[0].mxu1 %vm453_vm1, %v428_v14  ;;  %v414_v19 = vld [vmem:[%s3434_s25 + $0x38] sm:$0xff]  ;;  %v415_v20 = vld [vmem:[%s3434_s25 + $0x40] sm:$0xff]  ;;  %v432_v22 = vld [vmem:[%s3434_s25 + $0xc8] sm:$0xff] }
  0x1f   : > { %2983 = vmatprep.mubr.msk.f32.mxu1 %vm453_vm1, %v429_v15  ;;  %3140 = vmatpush3.bf16.msra.mxu1 %v3137_v3  ;;  %v3473_v21 = vld [vmem:[%s3464_s17] sm:$0xff]  ;;  %v3480_v23 = vld [vmem:[%s3464_s17 + $0x10] sm:$0xff]  ;;  %v3487_v25 = vld [vmem:[%s3464_s17 + $0x8] sm:$0xff] }
  0x20   : > { %2954 = vmatmul.mubr.msk.f32.gmra.mrb[2].mxu0 %vm453_vm1, %v410_v7  ;;  %3142 = vmatprep.subr.bf16.mxu1 %v3141_v12  ;;  %v433_v24 = vld [vmem:[%s3434_s25 + $0xd0] sm:$0xff]  ;;  %v416_v26 = vld [vmem:[%s3434_s25 + $0x48] sm:$0xff]  ;;  %v3492_v27 = vld [vmem:[%s3464_s17 + $0x18] sm:$0xff] }
  0x21   : > { %2956 = vmatprep.mubr.msk.f32.mxu0 %vm453_vm1, %v411_v10  ;;  %941 = vrot.lane.b32.xlu0 %v3473_v21, %s3340_s18  ;;  %v417_v28 = vld [vmem:[%s3434_s25 + $0x50] sm:$0xff]  ;;  %v434_v29 = vld [vmem:[%s3434_s25 + $0xd8] sm:$0xff]  ;;  %v435_v30 = vld [vmem:[%s3434_s25 + $0xe0] sm:$0xff] }
  0x22   : > { %2984 = vmatmul.mubr.msk.f32.gmra.mrb[2].mxu1 %vm453_vm1, %v430_v17  ;;  %945 = vrot.lane.b32.xlu1 %v3480_v23, %s3340_s18  ;;  %v3505_v31 = vld [vmem:[%s3464_s17 + $0x20] sm:$0xff]  ;;  %v418_v32 = vld [vmem:[%s3434_s25 + $0x58] sm:$0xff]  ;;  %v3510_v33 = vld [vmem:[%s3464_s17 + $0x28] sm:$0xff] }
  0x23   : > { %2986 = vmatprep.mubr.msk.f32.mxu1 %vm453_vm1, %v431_v18  ;;  %3144 = vmatpush3.bf16.msra.mxu1 %v3141_v12  ;;  %v419_v34 = vld [vmem:[%s3434_s25 + $0x60] sm:$0xff]  ;;  %v436_v35 = vld [vmem:[%s3434_s25 + $0xe8] sm:$0xff]  ;;  %v437_v36 = vld [vmem:[%s3434_s25 + $0xf0] sm:$0xff] }
  0x24   : > { %2957 = vmatmul.mubr.msk.f32.gmra.mrb[4].mxu0 %vm453_vm1, %v412_v13  ;;  %v3523_v37 = vld [vmem:[%s3464_s17 + $0x30] sm:$0xff]  ;;  %v420_v38 = vld [vmem:[%s3434_s25 + $0x68] sm:$0xff]  ;;  %v3528_v39 = vld [vmem:[%s3464_s17 + $0x38] sm:$0xff] }
  0x25   : > { %2959 = vmatprep.mubr.msk.f32.mxu0 %vm453_vm1, %v413_v16  ;;  %943 = vrot.lane.b32.xlu0 %v3487_v25, %s3340_s18  ;;  %v421_v40 = vld [vmem:[%s3434_s25 + $0x70] sm:$0xff]  ;;  %v438_v41 = vld [vmem:[%s3434_s25 + $0xf8] sm:$0xff]  ;;  %v439_v42 = vld [vmem:[%s3434_s25 + $0x100] sm:$0xff] }
  0x26   : > { %2987 = vmatmul.mubr.msk.f32.gmra.mrb[4].mxu1 %vm453_vm1, %v432_v22  ;;  %947 = vrot.lane.b32.xlu1 %v3492_v27, %s3340_s18  ;;  %v3541_v43 = vld [vmem:[%s3464_s17 + $0x40] sm:$0xff]  ;;  %v422_v44 = vld [vmem:[%s3434_s25 + $0x78] sm:$0xff]  ;;  %v3546_v45 = vld [vmem:[%s3464_s17 + $0x48] sm:$0xff]  ;;  %v3728_v22 = vadd.f32 1.0, %v3480_v23 }
  0x27   : > { %2989 = vmatprep.mubr.msk.f32.mxu1 %vm453_vm1, %v433_v24  ;;  %v423_v46 = vld [vmem:[%s3434_s25 + $0x80] sm:$0xff]  ;;  %v440_v47 = vld [vmem:[%s3434_s25 + $0x108] sm:$0xff]  ;;  %v441_v48 = vld [vmem:[%s3434_s25 + $0x110] sm:$0xff]  ;;  %v3731_v24 = vadd.f32 1.0, %v3492_v27 }
  0x28   : > { %2960 = vmatmul.mubr.msk.f32.gmra.mrb[6].mxu0 %vm453_vm1, %v414_v19  ;;  %v3559_v49 = vld [vmem:[%s3464_s17 + $0x50] sm:$0xff]  ;;  %v424_v50 = vld [vmem:[%s3434_s25 + $0x88] sm:$0xff]  ;;  %v3564_v51 = vld [vmem:[%s3464_s17 + $0x58] sm:$0xff]  ;;  %v3714_v19 = vadd.f32 1.0, %v3473_v21 }
  0x29   : > { %2962 = vmatprep.mubr.msk.f32.mxu0 %vm453_vm1, %v415_v20  ;;  %949 = vrot.lane.b32.xlu0 %v3505_v31, %s3340_s18  ;;  %v425_v52 = vld [vmem:[%s3434_s25 + $0x90] sm:$0xff]  ;;  %v442_v53 = vld [vmem:[%s3434_s25 + $0x118] sm:$0xff]  ;;  %v443_v54 = vld [vmem:[%s3434_s25 + $0x120] sm:$0xff]  ;;  %v3717_v20 = vadd.f32 1.0, %v3487_v25 }
  0x2a   : > { %2990 = vmatmul.mubr.msk.f32.gmra.mrb[6].mxu1 %vm453_vm1, %v434_v29  ;;  %951 = vrot.lane.b32.xlu1 %v3510_v33, %s3340_s18  ;;  %v3577_v55 = vld [vmem:[%s3464_s17 + $0x60] sm:$0xff]  ;;  %v426_v56 = vld [vmem:[%s3434_s25 + $0x98] sm:$0xff]  ;;  %v3582_v57 = vld [vmem:[%s3464_s17 + $0x68] sm:$0xff]  ;;  %v3784_v29 = vadd.f32 1.0, %v3564_v51 }
  0x2b   : > { %2992 = vmatprep.mubr.msk.f32.mxu1 %vm453_vm1, %v435_v30  ;;  %v444_v58 = vld [vmem:[%s3434_s25 + $0x128] sm:$0xff]  ;;  %v3593_v59 = vld [vmem:[%s3464_s17 + $0x70] sm:$0xff]  ;;  %v3596_v60 = vld [vmem:[%s3464_s17 + $0x78] sm:$0xff]  ;;  %v3787_v30 = vadd.f32 1.0, %v3559_v49 }
  0x2c   : > { %2963 = vmatmul.mubr.msk.f32.gmra.mrb[8].mxu0 %vm453_vm1, %v416_v26  ;;  %v3604_v61 = vld [vmem:[%s3464_s17 + $0x80] sm:$0xff]  ;;  %v3607_v62 = vld [vmem:[%s3464_s17 + $0x88] sm:$0xff]  ;;  %v3614_v63 = vld [vmem:[%s3464_s17 + $0x90] sm:$0xff]  ;;  %v3759_v26 = vadd.f32 1.0, %v3523_v37 }
  0x2d   : > { %2965 = vmatprep.mubr.msk.f32.mxu0 %vm453_vm1, %v417_v28  ;;  %953 = vrot.lane.b32.xlu0 %v3523_v37, %s3340_s18  ;;  %v3617_v0 = vld [vmem:[%s3464_s17 + $0x98] sm:$0xff]  ;;  %v3624_v1 = vld [vmem:[%s3464_s17 + $0xa0] sm:$0xff]  ;;  %v3627_v2 = vld [vmem:[%s3464_s17 + $0xa8] sm:$0xff]  ;;  %v3773_v28 = vadd.f32 1.0, %v3541_v43 }
  0x2e   : > { %2993 = vmatmul.mubr.msk.f32.gmra.mrb[8].mxu1 %vm453_vm1, %v436_v35  ;;  %955 = vrot.lane.b32.xlu1 %v3528_v39, %s3340_s18  ;;  %v3634_v3 = vld [vmem:[%s3464_s17 + $0xb0] sm:$0xff]  ;;  %v3637_v4 = vld [vmem:[%s3464_s17 + $0xb8] sm:$0xff]  ;;  %v3644_v5 = vld [vmem:[%s3464_s17 + $0xc0] sm:$0xff] }
  0x2f   : > { %2995 = vmatprep.mubr.msk.f32.mxu1 %vm453_vm1, %v437_v36  ;;  %v3647_v6 = vld [vmem:[%s3464_s17 + $0xc8] sm:$0xff]  ;;  %v3654_v7 = vld [vmem:[%s3464_s17 + $0xd0] sm:$0xff]  ;;  %v3657_v8 = vld [vmem:[%s3464_s17 + $0xd8] sm:$0xff] }
  0x30   : > { %2966 = vmatmul.mubr.msk.f32.gmra.mrb[10].mxu0 %vm453_vm1, %v418_v32  ;;  %v3664_v9 = vld [vmem:[%s3464_s17 + $0xe0] sm:$0xff]  ;;  %v3667_v10 = vld [vmem:[%s3464_s17 + $0xe8] sm:$0xff]  ;;  %v3674_v11 = vld [vmem:[%s3464_s17 + $0xf0] sm:$0xff]  ;;  %v3801_v32 = vadd.f32 1.0, %v3577_v55 }
  0x31   : > { %2968 = vmatprep.mubr.msk.f32.mxu0 %vm453_vm1, %v419_v34  ;;  %957 = vrot.lane.b32.xlu0 %v3541_v43, %s3340_s18  ;;  %v3677_v12 = vld [vmem:[%s3464_s17 + $0xf8] sm:$0xff]  ;;  %v3684_v13 = vld [vmem:[%s3464_s17 + $0x100] sm:$0xff]  ;;  %v3687_v14 = vld [vmem:[%s3464_s17 + $0x108] sm:$0xff] }
  0x32   : > { %2996 = vmatmul.mubr.msk.f32.gmra.mrb[10].mxu1 %vm453_vm1, %v438_v41  ;;  %959 = vrot.lane.b32.xlu1 %v3546_v45, %s3340_s18  ;;  %v3694_v15 = vld [vmem:[%s3464_s17 + $0x110] sm:$0xff]  ;;  %v3697_v16 = vld [vmem:[%s3464_s17 + $0x118] sm:$0xff]  ;;  %v3704_v17 = vld [vmem:[%s3464_s17 + $0x120] sm:$0xff] }
  0x33   : > { %2998 = vmatprep.mubr.msk.f32.mxu1 %vm453_vm1, %v439_v42  ;;  %4791 = vst [vmem:[#allocation3_spill] sm:$0xff] %v3694_v15  ;;  %4792 = vst [vmem:[#allocation4_spill] sm:$0xff] %v3704_v17  ;;  %v3707_v18 = vld [vmem:[%s3464_s17 + $0x128] sm:$0xff]  ;;  %v1894_v35 = vld [vmem:[%s4779_s6 + $0x10] sm:$0xff] }
  0x34   : > { %2969 = vmatmul.mubr.msk.f32.gmra.mrb[12].mxu0 %vm453_vm1, %v420_v38  ;;  %4793 = vst [vmem:[#allocation5_spill] sm:$0xff] %v3707_v18  ;;  %v1893_v34 = vld [vmem:[%s4779_s6 + $0x8] sm:$0xff] }
  0x35   : > { %2971 = vmatprep.mubr.msk.f32.mxu0 %vm453_vm1, %v421_v40  ;;  %961 = vrot.lane.b32.xlu0 %v3559_v49, %s3340_s18  ;;  %v3827_v40 = vadd.f32 1.0, %v3593_v59 }
  0x36   : > { %2999 = vmatmul.mubr.msk.f32.gmra.mrb[12].mxu1 %vm453_vm1, %v440_v47  ;;  %963 = vrot.lane.b32.xlu1 %v3564_v51, %s3340_s18 }
  0x37   : > { %3001 = vmatprep.mubr.msk.f32.mxu1 %vm453_vm1, %v441_v48 }
  0x38   : > { %2972 = vmatmul.mubr.msk.f32.gmra.mrb[14].mxu0 %vm453_vm1, %v422_v44 }
  0x39   : > { %2974 = vmatprep.mubr.msk.f32.mxu0 %vm453_vm1, %v423_v46  ;;  %965 = vrot.lane.b32.xlu0 %v3577_v55, %s3340_s18  ;;  %v3845_v46 = vadd.f32 1.0, %v3604_v61 }
  0x3a   : > { %3002 = vmatmul.mubr.msk.f32.gmra.mrb[14].mxu1 %vm453_vm1, %v442_v53  ;;  %967 = vrot.lane.b32.xlu1 %v3582_v57, %s3340_s18 }
  0x3b   : > { %3004 = vmatprep.mubr.msk.f32.mxu1 %vm453_vm1, %v443_v54  ;;  %v3880_v54 = vadd.f32 1.0, %v3627_v2 }
  0x3c   : > { %2975 = vmatmul.mubr.msk.f32.gmra.mrb[16].mxu0 %vm453_vm1, %v424_v50  ;;  %v3863_v50 = vadd.f32 1.0, %v3614_v63 }
  0x3d   : > { %2977 = vmatprep.mubr.msk.f32.mxu0 %vm453_vm1, %v425_v52  ;;  %969 = vrot.lane.b32.xlu0 %v3593_v59, %s3340_s18 }
  0x3e   : > { %3005 = vmatmul.mubr.msk.f32.gmra.mrb[16].mxu1 %vm453_vm1, %v444_v58  ;;  %971 = vrot.lane.b32.xlu1 %v3596_v60, %s3340_s18 }
  0x40   : > { %2978 = vmatmul.mubr.msk.f32.gmra.mrb[18].mxu0 %vm453_vm1, %v426_v56 }
  0x41   : > { %973 = vrot.lane.b32.xlu0 %v3604_v61, %s3340_s18 }
  0x42   : > { %975 = vrot.lane.b32.xlu1 %v3607_v62, %s3340_s18 }
  0x45   : > { %977 = vrot.lane.b32.xlu0 %v3614_v63, %s3340_s18 }
  0x46   : > { %979 = vrot.lane.b32.xlu1 %v3617_v0, %s3340_s18 }
  0x49   : > { %981 = vrot.lane.b32.xlu0 %v3624_v1, %s3340_s18 }
  0x4a   : > { %983 = vrot.lane.b32.xlu1 %v3627_v2, %s3340_s18 }
  0x4d   : > { %985 = vrot.lane.b32.xlu0 %v3634_v3, %s3340_s18 }
  0x4e   : > { %987 = vrot.lane.b32.xlu1 %v3637_v4, %s3340_s18 }
  0x51   : > { %989 = vrot.lane.b32.xlu0 %v3644_v5, %s3340_s18 }
  0x52   : > { %991 = vrot.lane.b32.xlu1 %v3647_v6, %s3340_s18 }
  0x55   : > { %993 = vrot.lane.b32.xlu0 %v3654_v7, %s3340_s18 }
  0x56   : > { %995 = vrot.lane.b32.xlu1 %v3657_v8, %s3340_s18 }
  0x59   : > { %997 = vrot.lane.b32.xlu0 %v3664_v9, %s3340_s18 }
  0x5a   : > { %999 = vrot.lane.b32.xlu1 %v3667_v10, %s3340_s18 }
  0x5d   : > { %1001 = vrot.lane.b32.xlu0 %v3674_v11, %s3340_s18 }
  0x5e   : > { %1003 = vrot.lane.b32.xlu1 %v3677_v12, %s3340_s18 }
  0x61   : > { %1005 = vrot.lane.b32.xlu0 %v3684_v13, %s3340_s18 }
  0x62   : > { %1007 = vrot.lane.b32.xlu1 %v3687_v14, %s3340_s18 }
  0x65   : > { %1009 = vrot.lane.b32.xlu0 %v3694_v15, %s3340_s18 }
  0x66   : > { %1011 = vrot.lane.b32.xlu1 %v3697_v16, %s3340_s18 }
  0x69   : > { %1013 = vrot.lane.b32.xlu0 %v3704_v17, %s3340_s18 }
  0x6a   : > { %1015 = vrot.lane.b32.xlu1 %v3707_v18, %s3340_s18  ;;  %s333_s18 = sand.u32 1, %s3298_s27   ;;  %s2319_s27 = ssub.s32 (%p3413_p4), 75, %s3421_s16 }
  0x6b   : > { %p2320_p8 = scmp.lt.s32.totalorder (%p3413_p4), %s2319_s27, 38 }
  0x6d   : > { %1550 = vrot.lane.b32.xlu0 %v3714_v19, %s3341_s19 }
  0x6e   : > { %1552 = vrot.lane.b32.xlu1 %v3717_v20, %s3341_s19 }
  0x71   : > { %1702 = vrot.lane.b32.xlu0 %v3473_v21, %s3342_s20  ;;  %v3742_v21 = vadd.f32 1.0, %v3510_v33 }
  0x72   : > { %1704 = vrot.lane.b32.xlu1 %v3487_v25, %s3342_s20  ;;  %v3745_v25 = vadd.f32 1.0, %v3505_v31 }
  0x75   : > { %1554 = vrot.lane.b32.xlu0 %v3728_v22, %s3341_s19 }
  0x76   : > { %1556 = vrot.lane.b32.xlu1 %v3731_v24, %s3341_s19 }
  0x79   : > { %1706 = vrot.lane.b32.xlu0 %v3480_v23, %s3342_s20  ;;  %v3756_v23 = vadd.f32 1.0, %v3528_v39 }
  0x7a   : > { %1708 = vrot.lane.b32.xlu1 %v3492_v27, %s3342_s20  ;;  %v3770_v27 = vadd.f32 1.0, %v3546_v45 }
  0x7d   : > { %1558 = vrot.lane.b32.xlu0 %v3745_v25, %s3341_s19 }
  0x7e   : > { %1560 = vrot.lane.b32.xlu1 %v3742_v21, %s3341_s19 }
  0x81   : > { %1710 = vrot.lane.b32.xlu0 %v3505_v31, %s3342_s20  ;;  %v3798_v31 = vadd.f32 1.0, %v3582_v57 }
  0x82   : > { %1712 = vrot.lane.b32.xlu1 %v3510_v33, %s3342_s20  ;;  %v1892_v33 = vld [vmem:[%s4779_s6] sm:$0xff] }
  0x83   : > { %v3145_v36 = vpack.c.bf16 %v1893_v34, %v1892_v33  ;;  %v3924_v33 = vadd.f32 1.0, %v3647_v6  ;;  %v3927_v34 = vadd.f32 1.0, %v3644_v5 }
  0x85   : > { %1562 = vrot.lane.b32.xlu0 %v3759_v26, %s3341_s19  ;;  %3146 = vmatprep.subr.bf16.mxu0 %v3145_v36  ;;  %4795 = vst [vmem:[#allocation7_spill] sm:$0xff] %v3924_v33 }
  0x86   : > { %1564 = vrot.lane.b32.xlu1 %v3756_v23, %s3341_s19  ;;  %3148 = vmatpush3.bf16.msra.mxu0 %v3145_v36 }
  0x89   : > { %1714 = vrot.lane.b32.xlu0 %v3523_v37, %s3342_s20  ;;  %v1895_v37 = vld [vmem:[%s4779_s6 + $0x18] sm:$0xff] }
  0x8a   : > { %1716 = vrot.lane.b32.xlu1 %v3528_v39, %s3342_s20  ;;  %v3149_v38 = vpack.c.bf16 %v1895_v37, %v1894_v35  ;;  %v3824_v39 = vadd.f32 1.0, %v3596_v60 }
  0x8c   : > { %3150 = vmatprep.subr.bf16.mxu0 %v3149_v38 }
  0x8d   : > { %1566 = vrot.lane.b32.xlu0 %v3773_v28, %s3341_s19  ;;  %3152 = vmatpush3.bf16.msra.mxu0 %v3149_v38 }
  0x8e   : > { %1568 = vrot.lane.b32.xlu1 %v3770_v27, %s3341_s19 }
  0x91   : > { %1718 = vrot.lane.b32.xlu0 %v3541_v43, %s3342_s20 }
  0x92   : > { %1720 = vrot.lane.b32.xlu1 %v3546_v45, %s3342_s20  ;;  %v3842_v45 = vadd.f32 1.0, %v3607_v62 }
  0x93   : > { %v942_v42 = vpop.permute.xlu0 %941 }
  0x94   : > { %v3829_v41 = vpop.permute.xlu1 %945 }
  0x95   : > { %1570 = vrot.lane.b32.xlu0 %v3787_v30, %s3341_s19 }
  0x96   : > { %1572 = vrot.lane.b32.xlu1 %v3784_v29, %s3341_s19 }
  0x97   : > { %v944_v44 = vpop.permute.xlu0 %943 }
  0x98   : > { %v3835_v43 = vpop.permute.xlu1 %947 }
  0x99   : > { %1722 = vrot.lane.b32.xlu0 %v3559_v49, %s3342_s20  ;;  %v3860_v49 = vadd.f32 1.0, %v3617_v0 }
  0x9a   : > { %1724 = vrot.lane.b32.xlu1 %v3564_v51, %s3342_s20 }
  0x9b   : > { %v3851_v47 = vpop.permute.xlu0 %949 }
  0x9c   : > { %v3853_v48 = vpop.permute.xlu1 %951 }
  0x9d   : > { %1574 = vrot.lane.b32.xlu0 %v3801_v32, %s3341_s19 }
  0x9e   : > { %1576 = vrot.lane.b32.xlu1 %v3798_v31, %s3341_s19 }
  0x9f   : > { %v3865_v51 = vpop.permute.xlu0 %953 }
  0xa0   : > { %v3867_v52 = vpop.permute.xlu1 %955 }
  0xa1   : > { %1726 = vrot.lane.b32.xlu0 %v3577_v55, %s3342_s20  ;;  %v3883_v55 = vadd.f32 1.0, %v3624_v1 }
  0xa2   : > { %1728 = vrot.lane.b32.xlu1 %v3582_v57, %s3342_s20 }
  0xa3   : > { %v3877_v53 = vpop.permute.xlu0 %957 }
  0xa4   : > { %v3885_v56 = vpop.permute.xlu1 %959 }
  0xa5   : > { %1578 = vrot.lane.b32.xlu0 %v3827_v40, %s3341_s19 }
  0xa6   : > { %1580 = vrot.lane.b32.xlu1 %v3824_v39, %s3341_s19 }
  0xa7   : > { %v3891_v57 = vpop.permute.xlu0 %961 }
  0xa8   : > { %v3893_v58 = vpop.permute.xlu1 %963 }
  0xa9   : > { %1730 = vrot.lane.b32.xlu0 %v3593_v59, %s3342_s20  ;;  %v3900_v59 = vadd.f32 1.0, %v3637_v4 }
  0xaa   : > { %1732 = vrot.lane.b32.xlu1 %v3596_v60, %s3342_s20  ;;  %v3903_v60 = vadd.f32 1.0, %v3634_v3 }
  0xab   : > { %4794 = vst [vmem:[#allocation6_spill] sm:$0xff] %v3900_v59 }
  0xad   : > { %1582 = vrot.lane.b32.xlu0 %v3845_v46, %s3341_s19 }
  0xae   : > { %1584 = vrot.lane.b32.xlu1 %v3842_v45, %s3341_s19 }
  0xb1   : > { %1734 = vrot.lane.b32.xlu0 %v3604_v61, %s3342_s20  ;;  %v3909_v61 = vpop.permute.xlu0 %965 }
  0xb2   : > { %1736 = vrot.lane.b32.xlu1 %v3607_v62, %s3342_s20  ;;  %v3914_v62 = vld [vmem:[%s4776_s3] ss:$0 sm:$0xff] }
  0xb5   : > { %1586 = vrot.lane.b32.xlu0 %v3863_v50, %s3341_s19  ;;  %v3931_v37 = vpop.permute.xlu0 %969 }
  0xb6   : > { %1588 = vrot.lane.b32.xlu1 %v3860_v49, %s3341_s19 }
  0xb9   : > { %1738 = vrot.lane.b32.xlu0 %v3614_v63, %s3342_s20  ;;  %v3916_v63 = vpop.permute.xlu1 %967 }
  0xba   : > { %1740 = vrot.lane.b32.xlu1 %v3617_v0, %s3342_s20 }
  0xbd   : > { %1590 = vrot.lane.b32.xlu0 %v3883_v55, %s3341_s19  ;;  %v3934_v17 = vpop.permute.xlu1 %971 }
  0xbe   : > { %1592 = vrot.lane.b32.xlu1 %v3880_v54, %s3341_s19 }
  0xc1   : > { %1742 = vrot.lane.b32.xlu0 %v3624_v1, %s3342_s20 }
  0xc2   : > { %1744 = vrot.lane.b32.xlu1 %v3627_v2, %s3342_s20 }
  0xc5   : > { %1594 = vrot.lane.b32.xlu0 %v3903_v60, %s3341_s19 }
  0xc6   : > { %1596 = vrot.lane.b32.xlu1 %v3900_v59, %s3341_s19 }
  0xc9   : > { %1746 = vrot.lane.b32.xlu0 %v3634_v3, %s3342_s20 }
  0xca   : > { %1748 = vrot.lane.b32.xlu1 %v3637_v4, %s3342_s20 }
  0xcd   : > { %1598 = vrot.lane.b32.xlu0 %v3927_v34, %s3341_s19 }
  0xce   : > { %1600 = vrot.lane.b32.xlu1 %v3924_v33, %s3341_s19 }
  0xd1   : > { %1750 = vrot.lane.b32.xlu0 %v3644_v5, %s3342_s20  ;;  %v3965_v5 = vpop.permute.xlu1 %975 }
  0xd2   : > { %1752 = vrot.lane.b32.xlu1 %v3647_v6, %s3342_s20 }
  0xef   : > { %v2952_v0 = vpop.f32.mrb[0].mxu0 }
  0xf0   : > { %v644_v1 = vadd.f32 %v2952_v0, %v3914_v62  ;;  %v638_v2 = vpop.f32.mrb[1].mxu0 }
  0xf1   : > { %v639_v35 = vadd.f32 %v3914_v62, %v638_v2 }
  0xf2   : > { %v866_v36 = vmul.f32 %v3717_v20, %v644_v1  ;;  %v3942_v1 = vpop.f32.mrb[0].mxu1 }
  0xf3   : > { %v865_v4 = vmul.f32 %v3714_v19, %v639_v35  ;;  %v2955_v38 = vpop.f32.mrb[2].mxu0  ;;  %v3945_v35 = vpop.f32.mrb[1].mxu1 }
  0xf4   : > { %v1056_v3 = vadd.f32 %v944_v44, %v866_v36  ;;  %v654_v0 = vadd.f32 %v2955_v38, %v3914_v62  ;;  %v648_v18 = vpop.f32.mrb[3].mxu0 }
  0xf5   : > { %v1055_v2 = vadd.f32 %v942_v42, %v865_v4  ;;  %v649_v20 = vadd.f32 %v3914_v62, %v648_v18  ;;  %v3957_v4 = vadd.f32 1.0, %v3657_v8 }
  0xf6   : > { %v868_v19 = vmul.f32 %v3731_v24, %v654_v0  ;;  %v1094_v42 = vmax.f32 %v1056_v3, 0.0  ;;  %v3954_v24 = vpop.permute.xlu0 %973 }
  0xf7   : > { %v1093_v59 = vmax.f32 %v1055_v2, 0.0  ;;  %v867_v33 = vmul.f32 %v3728_v22, %v649_v20  ;;  %v2958_v15 = vpop.f32.mrb[4].mxu0  ;;  %v3960_v22 = vadd.f32 1.0, %v3654_v7  ;;  %1604 = vrot.lane.b32.xlu1 %v3957_v4, %s3341_s19 }
  0xf8   : > { %v1058_v18 = vadd.f32 %v3835_v43, %v868_v19  ;;  %v664_v44 = vadd.f32 %v2958_v15, %v3914_v62  ;;  %v658_v36 = vpop.f32.mrb[5].mxu0  ;;  %v3967_v43 = vpop.f32.mrb[2].mxu1 }
  0xf9   : > { %v1057_v38 = vadd.f32 %v3829_v41, %v867_v33  ;;  %v659_v6 = vadd.f32 %v3914_v62, %v658_v36  ;;  %3015 = vmatprep.mubr.msk.f32.mxu1 %vm1142_vm2, %v1093_v59  ;;  %v3971_v3 = vpop.f32.mrb[3].mxu1  ;;  %1602 = vrot.lane.b32.xlu0 %v3960_v22, %s3341_s19 }
  0xfa   : > { %v870_v15 = vmul.f32 %v3742_v21, %v664_v44  ;;  %3016 = vmatmul.mubr.msk.f32.vlgmr.msra.gmra.mrb[18].mxu1 %vm1142_vm2, %v1094_v42  ;;  %v1096_v41 = vmax.f32 %v1058_v18, 0.0  ;;  %v3987_v36 = vpop.permute.xlu0 %977 }
  0xfb   : > { %v1095_v0 = vmax.f32 %v1057_v38, 0.0  ;;  %v869_v2 = vmul.f32 %v3745_v25, %v659_v6  ;;  %v2961_v20 = vpop.f32.mrb[6].mxu0  ;;  %v3983_v25 = vpop.f32.mrb[4].mxu1  ;;  %1756 = vrot.lane.b32.xlu1 %v3657_v8, %s3342_s20 }
  0xfc   : > { %v1060_v59 = vadd.f32 %v3853_v48, %v870_v15  ;;  %v674_v33 = vadd.f32 %v2961_v20, %v3914_v62  ;;  %v668_v21 = vpop.f32.mrb[7].mxu0  ;;  %v3989_v18 = vpop.f32.mrb[5].mxu1  ;;  %v4001_v20 = vadd.f32 1.0, %v3667_v10 }
  0xfd   : > { %v1059_v19 = vadd.f32 %v3851_v47, %v869_v2  ;;  %v669_v42 = vadd.f32 %v3914_v62, %v668_v21  ;;  %3018 = vmatprep.mubr.msk.f32.mxu1 %vm1142_vm2, %v1095_v0  ;;  %v3992_v15 = vpop.permute.xlu1 %979  ;;  %1754 = vrot.lane.b32.xlu0 %v3654_v7, %s3342_s20  ;;  %v4009_v8 = vpop.f32.mrb[6].mxu1 }
  0xfe   : > { %v872_v44 = vmul.f32 %v3756_v23, %v674_v33  ;;  %3019 = vmatmul.mubr.msk.f32.gmra.mrb[20].mxu1 %vm1142_vm2, %v1096_v41  ;;  %v1098_v47 = vmax.f32 %v1060_v59, 0.0 }
  0xff   : > { %v1097_v48 = vmax.f32 %v1059_v19, 0.0  ;;  %v871_v38 = vmul.f32 %v3759_v26, %v669_v42  ;;  %v2964_v6 = vpop.f32.mrb[8].mxu0  ;;  %v4004_v26 = vadd.f32 1.0, %v3664_v9  ;;  %1608 = vrot.lane.b32.xlu1 %v4001_v20, %s3341_s19 }
 0x100   : > { %v1062_v23 = vadd.f32 %v3867_v52, %v872_v44  ;;  %v684_v0 = vadd.f32 %v2964_v6, %v3914_v62  ;;  %v678_v2 = vpop.f32.mrb[9].mxu0  ;;  %v4013_v52 = vpop.f32.mrb[7].mxu1 }
 0x101   : > { %v1061_v41 = vadd.f32 %v3865_v51, %v871_v38  ;;  %v679_v33 = vadd.f32 %v3914_v62, %v678_v2  ;;  %3021 = vmatprep.mubr.msk.f32.mxu1 %vm1142_vm2, %v1097_v48  ;;  %1606 = vrot.lane.b32.xlu0 %v4004_v26, %s3341_s19  ;;  %v4022_v48 = vpop.permute.xlu0 %981 }
 0x102   : > { %v874_v7 = vmul.f32 %v3770_v27, %v684_v0  ;;  %3022 = vmatmul.mubr.msk.f32.gmra.mrb[22].mxu1 %vm1142_vm2, %v1098_v47  ;;  %v1100_v51 = vmax.f32 %v1062_v23, 0.0  ;;  %v4029_v47 = vpop.f32.mrb[8].mxu1 }
 0x103   : > { %v1099_v59 = vmax.f32 %v1061_v41, 0.0  ;;  %v873_v21 = vmul.f32 %v3773_v28, %v679_v33  ;;  %v2967_v19 = vpop.f32.mrb[10].mxu0  ;;  %v4027_v28 = vpop.permute.xlu1 %983  ;;  %1760 = vrot.lane.b32.xlu1 %v3667_v10, %s3342_s20 }
 0x104   : > { %v1064_v42 = vadd.f32 %v3885_v56, %v874_v7  ;;  %v694_v44 = vadd.f32 %v2967_v19, %v3914_v62  ;;  %v688_v27 = vpop.f32.mrb[11].mxu0  ;;  %v4033_v56 = vpop.f32.mrb[9].mxu1 }
 0x105   : > { %v1063_v38 = vadd.f32 %v3877_v53, %v873_v21  ;;  %v689_v6 = vadd.f32 %v3914_v62, %v688_v27  ;;  %3024 = vmatprep.mubr.msk.f32.mxu1 %vm1142_vm2, %v1099_v59  ;;  %1758 = vrot.lane.b32.xlu0 %v3664_v9, %s3342_s20  ;;  %v4043_v59 = vadd.f32 1.0, %v3677_v12  ;;  %v4046_v21 = vadd.f32 1.0, %v3674_v11  ;;  %v4051_v10 = vpop.f32.mrb[10].mxu1 }
 0x106   : > { %v876_v0 = vmul.f32 %v3784_v29, %v694_v44  ;;  %3025 = vmatmul.mubr.msk.f32.gmra.mrb[24].mxu1 %vm1142_vm2, %v1100_v51  ;;  %v1102_v53 = vmax.f32 %v1064_v42, 0.0  ;;  %v4057_v51 = vpop.f32.mrb[11].mxu1 }
 0x107   : > { %v1101_v23 = vmax.f32 %v1063_v38, 0.0  ;;  %v875_v2 = vmul.f32 %v3787_v30, %v689_v6  ;;  %v2970_v41 = vpop.f32.mrb[12].mxu0  ;;  %v4060_v38 = vpop.permute.xlu1 %987  ;;  %1612 = vrot.lane.b32.xlu1 %v4043_v59, %s3341_s19 }
 0x108   : > { %v1066_v33 = vadd.f32 %v3893_v58, %v876_v0  ;;  %v704_v7 = vadd.f32 %v2970_v41, %v3914_v62  ;;  %v698_v29 = vpop.f32.mrb[13].mxu0  ;;  %v4055_v58 = vpop.permute.xlu0 %985 }
 0x109   : > { %v1065_v30 = vadd.f32 %v3891_v57, %v875_v2  ;;  %v699_v19 = vadd.f32 %v3914_v62, %v698_v29  ;;  %3027 = vmatprep.mubr.msk.f32.mxu1 %vm1142_vm2, %v1101_v23  ;;  %1610 = vrot.lane.b32.xlu0 %v4046_v21, %s3341_s19 }
 0x10a   : > { %v878_v9 = vmul.f32 %v3798_v31, %v704_v7  ;;  %3028 = vmatmul.mubr.msk.f32.gmra.mrb[26].mxu1 %vm1142_vm2, %v1102_v53  ;;  %v1104_v57 = vmax.f32 %v1066_v33, 0.0  ;;  %v739_v53 = vadd.f32 %v3914_v62, %v3945_v35 }
 0x10b   : > { %v1103_v42 = vmax.f32 %v1065_v30, 0.0  ;;  %v877_v44 = vmul.f32 %v3801_v32, %v699_v19  ;;  %v2973_v27 = vpop.f32.mrb[14].mxu0  ;;  %v3000_v32 = vpop.f32.mrb[12].mxu1  ;;  %1764 = vrot.lane.b32.xlu1 %v3677_v12, %s3342_s20 }
 0x10c   : > { %v1068_v31 = vadd.f32 %v3916_v63, %v878_v9  ;;  %v714_v6 = vadd.f32 %v2973_v27, %v3914_v62  ;;  %v708_v0 = vpop.f32.mrb[15].mxu0  ;;  %v4076_v33 = vadd.f32 %v3000_v32, %v3914_v62  ;;  %v4078_v63 = vpop.f32.mrb[13].mxu1 }
 0x10d   : > { %v1067_v23 = vadd.f32 %v3909_v61, %v877_v44  ;;  %v709_v2 = vadd.f32 %v3914_v62, %v708_v0  ;;  %3030 = vmatprep.mubr.msk.f32.mxu1 %vm1142_vm2, %v1103_v42  ;;  %1762 = vrot.lane.b32.xlu0 %v3674_v11, %s3342_s20  ;;  %v4087_v9 = vpop.permute.xlu0 %989  ;;  %v4090_v42 = vadd.f32 1.0, %v3687_v14  ;;  %v4098_v11 = vpop.permute.xlu1 %991 }
 0x10e   : > { %v880_v41 = vmul.f32 %v3824_v39, %v714_v6  ;;  %3031 = vmatmul.mubr.msk.f32.gmra.mrb[28].mxu1 %vm1142_vm2, %v1104_v57  ;;  %v1106_v39 = vmax.f32 %v1068_v31, 0.0  ;;  %v885_v57 = vmul.f32 %v3883_v55, %v739_v53  ;;  %v749_v31 = vadd.f32 %v3914_v62, %v3971_v3 }
 0x10f   : > { %v1105_v7 = vmax.f32 %v1067_v23, 0.0  ;;  %v879_v61 = vmul.f32 %v3827_v40, %v709_v2  ;;  %v2976_v29 = vpop.f32.mrb[16].mxu0  ;;  %v4093_v40 = vadd.f32 1.0, %v3684_v13  ;;  %1616 = vrot.lane.b32.xlu1 %v4090_v42, %s3341_s19  ;;  %v744_v53 = vadd.f32 %v3942_v1, %v3914_v62 }
 0x110   : > { %v1070_v30 = vadd.f32 %v3934_v17, %v880_v41  ;;  %v724_v35 = vadd.f32 %v2976_v29, %v3914_v62  ;;  %v718_v19 = vpop.f32.mrb[17].mxu0  ;;  %v3003_v17 = vpop.f32.mrb[14].mxu1 }
 0x111   : > { %v1069_v44 = vadd.f32 %v3931_v37, %v879_v61  ;;  %v719_v12 = vadd.f32 %v3914_v62, %v718_v19  ;;  %3033 = vmatprep.mubr.msk.f32.mxu1 %vm1142_vm2, %v1105_v7  ;;  %v4106_v6 = vadd.f32 %v3003_v17, %v3914_v62  ;;  %v808_v37 = vpop.f32.mrb[15].mxu1  ;;  %1614 = vrot.lane.b32.xlu0 %v4093_v40, %s3341_s19 }
 0x112   : > { %3034 = vmatmul.mubr.msk.f32.gmra.mrb[30].mxu1 %vm1142_vm2, %v1106_v39  ;;  %v882_v27 = vmul.f32 %v3842_v45, %v724_v35  ;;  %v4110_v32 = vadd.f32 %v3914_v62, %v808_v37  ;;  %v1108_v45 = vmax.f32 %v1070_v30, 0.0  ;;  %v3006_v61 = vpop.f32.mrb[16].mxu1  ;;  %v1075_v39 = vadd.f32 %v4022_v48, %v885_v57  ;;  %v994_v30 = vpop.permute.xlu0 %993 }
 0x113   : > { %v1107_v0 = vmax.f32 %v1069_v44, 0.0  ;;  %v881_v23 = vmul.f32 %v3845_v46, %v719_v12  ;;  %v2979_v2 = vpop.f32.mrb[18].mxu0  ;;  %v4128_v35 = vadd.f32 %v3006_v61, %v3914_v62  ;;  %v818_v1 = vpop.f32.mrb[17].mxu1  ;;  %v759_v44 = vadd.f32 %v3914_v62, %v3989_v18  ;;  %1768 = vrot.lane.b32.xlu1 %v3687_v14, %s3342_s20 }
 0x114   : > { %v1072_v55 = vadd.f32 %v3965_v5, %v882_v27  ;;  %v734_v3 = vadd.f32 %v2979_v2, %v3914_v62  ;;  %v728_v41 = vpop.f32.mrb[19].mxu0  ;;  %v887_v5 = vmul.f32 %v3903_v60, %v749_v31  ;;  %v4133_v12 = vpop.permute.xlu1 %995  ;;  %v4136_v17 = vadd.f32 %v3914_v62, %v818_v1  ;;  %v4796_v27 = vld [vmem:[#allocation3_spill] sm:$0xff] }
 0x115   : > { %v1071_v46 = vadd.f32 %v3954_v24, %v881_v23  ;;  %v729_v7 = vadd.f32 %v3914_v62, %v728_v41  ;;  %3036 = vmatprep.mubr.msk.f32.mxu1 %vm1142_vm2, %v1107_v0  ;;  %1766 = vrot.lane.b32.xlu0 %v3684_v13, %s3342_s20  ;;  %v886_v48 = vmul.f32 %v3880_v54, %v744_v53  ;;  %v4147_v18 = vadd.f32 1.0, %v3697_v16  ;;  %v4797_v23 = vld [vmem:[#allocation6_spill] sm:$0xff]  ;;  %v4798_v53 = vld [vmem:[#allocation7_spill] sm:$0xff] }
 0x116   : > { %3037 = vmatmul.mubr.msk.f32.gmra.mrb[32].mxu1 %vm1142_vm2, %v1108_v45  ;;  %v884_v29 = vmul.f32 %v3860_v49, %v734_v3  ;;  %v1110_v49 = vmax.f32 %v1072_v55, 0.0  ;;  %v4150_v57 = vadd.f32 1.0, %v4796_v27  ;;  %v1113_v13 = vmax.f32 %v1075_v39, 0.0 }
 0x117   : > { %v1109_v19 = vmax.f32 %v1071_v46, 0.0  ;;  %v883_v24 = vmul.f32 %v3863_v50, %v729_v7  ;;  %v754_v50 = vadd.f32 %v3967_v43, %v3914_v62  ;;  %v889_v43 = vmul.f32 %v3927_v34, %v759_v44  ;;  %1620 = vrot.lane.b32.xlu1 %v4147_v18, %s3341_s19 }
 0x118   : > { %v1074_v60 = vadd.f32 %v3992_v15, %v884_v29  ;;  %v1077_v15 = vadd.f32 %v4055_v58, %v887_v5  ;;  %v769_v54 = vadd.f32 %v3914_v62, %v4013_v52  ;;  %v1076_v37 = vadd.f32 %v4027_v28, %v886_v48  ;;  %v998_v58 = vpop.permute.xlu0 %997  ;;  %v1000_v34 = vpop.permute.xlu1 %999 }
 0x119   : > { %v1073_v31 = vadd.f32 %v3987_v36, %v883_v24  ;;  %3039 = vmatprep.mubr.msk.f32.mxu1 %vm1142_vm2, %v1109_v19  ;;  %1618 = vrot.lane.b32.xlu0 %v4150_v57, %s3341_s19  ;;  %v764_v0 = vadd.f32 %v3983_v25, %v3914_v62  ;;  %v888_v2 = vmul.f32 %v4797_v23, %v754_v50 }
 0x11a   : > { %3040 = vmatmul.mubr.msk.f32.gmra.mrb[34].mxu1 %vm1142_vm2, %v1110_v49  ;;  %v1112_v36 = vmax.f32 %v1074_v60, 0.0  ;;  %v1115_v52 = vmax.f32 %v1077_v15, 0.0  ;;  %v1079_v45 = vadd.f32 %v4087_v9, %v889_v43  ;;  %v891_v55 = vmul.f32 %v3960_v22, %v769_v54  ;;  %v4799_v9 = vld [vmem:[#allocation5_spill] sm:$0xff]  ;;  %v4800_v22 = vld [vmem:[#allocation4_spill] sm:$0xff] }
 0x11b   : > { %v1111_v14 = vmax.f32 %v1073_v31, 0.0  ;;  %v779_v28 = vadd.f32 %v3914_v62, %v4033_v56  ;;  %1772 = vrot.lane.b32.xlu1 %v3697_v16, %s3342_s20  ;;  %v1114_v25 = vmax.f32 %v1076_v37, 0.0  ;;  %v1078_v3 = vadd.f32 %v4060_v38, %v888_v2 }
 0x11c   : > { %v774_v41 = vadd.f32 %v4009_v8, %v3914_v62  ;;  %v890_v46 = vmul.f32 %v4798_v53, %v764_v0  ;;  %v4183_v7 = vadd.f32 1.0, %v4799_v9  ;;  %v863_v61 = vadd.f32 1.0, %v4800_v22  ;;  %v1002_v56 = vpop.permute.xlu0 %1001  ;;  %v1004_v39 = vpop.permute.xlu1 %1003 }
 0x11d   : > { %3042 = vmatprep.mubr.msk.f32.mxu1 %vm1142_vm2, %v1111_v14  ;;  %1770 = vrot.lane.b32.xlu0 %v4796_v27, %s3342_s20  ;;  %v1117_v16 = vmax.f32 %v1079_v45, 0.0  ;;  %v1081_v38 = vadd.f32 %v994_v30, %v891_v55  ;;  %v893_v29 = vmul.f32 %v4004_v26, %v779_v28  ;;  %v789_v8 = vadd.f32 %v3914_v62, %v4057_v51 }
 0x11e   : > { %3043 = vmatmul.mubr.msk.f32.gmra.mrb[36].mxu1 %vm1142_vm2, %v1112_v36  ;;  %v1116_v5 = vmax.f32 %v1078_v3, 0.0  ;;  %v1080_v1 = vadd.f32 %v4098_v11, %v890_v46  ;;  %v784_v19 = vadd.f32 %v4029_v47, %v3914_v62  ;;  %v892_v24 = vmul.f32 %v3957_v4, %v774_v41 }
 0x11f   : > { %3045 = vmatprep.mubr.msk.f32.mxu1 %vm1142_vm2, %v1113_v13  ;;  %1624 = vrot.lane.b32.xlu1 %v4183_v7, %s3341_s19  ;;  %v1119_v26 = vmax.f32 %v1081_v38, 0.0  ;;  %v1083_v51 = vadd.f32 %v998_v58, %v893_v29  ;;  %v895_v30 = vmul.f32 %v4046_v21, %v789_v8  ;;  %v799_v44 = vadd.f32 %v3914_v62, %v4078_v63 }
 0x120   : > { %v1118_v11 = vmax.f32 %v1080_v1, 0.0  ;;  %v1082_v47 = vadd.f32 %v4133_v12, %v892_v24  ;;  %v794_v4 = vadd.f32 %v4051_v10, %v3914_v62  ;;  %v894_v49 = vmul.f32 %v4001_v20, %v784_v19  ;;  %v1006_v60 = vpop.permute.xlu0 %1005  ;;  %v1008_v50 = vpop.permute.xlu1 %1007 }
 0x121   : > { %1622 = vrot.lane.b32.xlu0 %v863_v61, %s3341_s19  ;;  %v1121_v21 = vmax.f32 %v1083_v51, 0.0  ;;  %v1085_v63 = vadd.f32 %v1002_v56, %v895_v30  ;;  %v897_v48 = vmul.f32 %v4093_v40, %v799_v44  ;;  %v899_v14 = vmul.f32 %v4150_v57, %v4110_v32  ;;  %s3155_s19 = smul.u32 304, %s333_s18 }
 0x122   : > { %3046 = vmatmul.mubr.msk.f32.gmra.mrb[38].mxu1 %vm1142_vm2, %v1114_v25  ;;  %v1120_v27 = vmax.f32 %v1082_v47, 0.0  ;;  %v1084_v12 = vadd.f32 %v1000_v34, %v894_v49  ;;  %v896_v31 = vmul.f32 %v4043_v59, %v794_v4  ;;  %v898_v40 = vmul.f32 %v4090_v42, %v4076_v33 }
 0x123   : > { %3048 = vmatprep.mubr.msk.f32.mxu1 %vm1142_vm2, %v1115_v52  ;;  %1776 = vrot.lane.b32.xlu1 %v4799_v9, %s3342_s20  ;;  %v1123_v20 = vmax.f32 %v1085_v63, 0.0  ;;  %v1087_v10 = vadd.f32 %v1006_v60, %v897_v48  ;;  %v901_v36 = vmul.f32 %v863_v61, %v4136_v17  ;;  %v900_v23 = vmul.f32 %v4147_v18, %v4106_v6  ;;  %s4510_s22 = scalar_lea.vmem [#allocation2], %s3155_s19  }
 0x124   : > { %v1010_v62 = vpop.permute.xlu0 %1009  ;;  %v1012_v13 = vpop.permute.xlu1 %1011  ;;  %v1122_v15 = vmax.f32 %v1084_v12, 0.0  ;;  %v1086_v43 = vadd.f32 %v1004_v39, %v896_v31  ;;  %v1088_v0 = vadd.f32 %v1008_v50, %v898_v40  ;;  %v902_v34 = vmul.f32 %v4183_v7, %v4128_v35 }
 0x125   : > { %1774 = vrot.lane.b32.xlu0 %v4800_v22, %s3342_s20  ;;  %v1125_v54 = vmax.f32 %v1087_v10, 0.0  ;;  %v1089_v59 = vadd.f32 %v1010_v62, %v899_v14  ;;  %v1090_v58 = vadd.f32 %v1012_v13, %v900_v23 }
 0x126   : > { %3049 = vmatmul.mubr.msk.f32.gmra.mrb[40].mxu1 %vm1142_vm2, %v1116_v5  ;;  %v1124_v37 = vmax.f32 %v1086_v43, 0.0  ;;  %v1126_v42 = vmax.f32 %v1088_v0, 0.0 }
 0x127   : > { %3051 = vmatprep.mubr.msk.f32.mxu1 %vm1142_vm2, %v1117_v16  ;;  %v1127_v57 = vmax.f32 %v1089_v59, 0.0  ;;  %v1128_v18 = vmax.f32 %v1090_v58, 0.0 }
 0x128   : > { %v1014_v2 = vpop.permute.xlu0 %1013  ;;  %v1016_v32 = vpop.permute.xlu1 %1015 }
 0x129   : > { %v1091_v33 = vadd.f32 %v1014_v2, %v901_v36  ;;  %v1092_v45 = vadd.f32 %v1016_v32, %v902_v34 }
 0x12a   : > { %3052 = vmatmul.mubr.msk.f32.gmra.mrb[42].mxu1 %vm1142_vm2, %v1118_v11 }
 0x12b   : > { %3054 = vmatprep.mubr.msk.f32.mxu1 %vm1142_vm2, %v1119_v26  ;;  %v1129_v6 = vmax.f32 %v1091_v33, 0.0  ;;  %v1130_v28 = vmax.f32 %v1092_v45, 0.0 }
 0x12c   : > { %v4230_v52 = vpop.permute.xlu1 %1552  ;;  %v4233_v17 = vpop.permute.xlu0 %1550 }
 0x12e   : > { %3055 = vmatmul.mubr.msk.f32.gmra.mrb[44].mxu1 %vm1142_vm2, %v1120_v27 }
 0x12f   : > { %3057 = vmatprep.mubr.msk.f32.mxu1 %vm1142_vm2, %v1121_v21 }
 0x130   : > { %v1705_v55 = vpop.permute.xlu1 %1704  ;;  %v1703_v25 = vpop.permute.xlu0 %1702 }
 0x132   : > { %3058 = vmatmul.mubr.msk.f32.gmra.mrb[46].mxu1 %vm1142_vm2, %v1122_v15 }
 0x133   : > { %3060 = vmatprep.mubr.msk.f32.mxu1 %vm1142_vm2, %v1123_v20 }
 0x134   : > { %v1557_v35 = vpop.permute.xlu1 %1556  ;;  %v1555_v3 = vpop.permute.xlu0 %1554 }
 0x136   : > { %3061 = vmatmul.mubr.msk.f32.gmra.mrb[48].mxu1 %vm1142_vm2, %v1124_v37  ;;  %v4330_v37 = vld [vmem:[%s4778_s5] ss:$0 sm:$0xff] }
 0x137   : > { %3063 = vmatprep.mubr.msk.f32.mxu1 %vm1142_vm2, %v1125_v54 }
 0x138   : > { %v4239_v41 = vpop.permute.xlu1 %1708  ;;  %v4241_v53 = vpop.permute.xlu0 %1706 }
 0x13a   : > { %3064 = vmatmul.mubr.msk.f32.gmra.mrb[50].mxu1 %vm1142_vm2, %v1126_v42 }
 0x13b   : > { %3066 = vmatprep.mubr.msk.f32.mxu1 %vm1142_vm2, %v1127_v57 }
 0x13c   : > { %v4243_v46 = vpop.permute.xlu1 %1560  ;;  %v4245_v9 = vpop.permute.xlu0 %1558 }
 0x13e   : > { %3067 = vmatmul.mubr.msk.f32.gmra.mrb[52].mxu1 %vm1142_vm2, %v1128_v18 }
 0x13f   : > { %3069 = vmatprep.mubr.msk.f32.mxu1 %vm1142_vm2, %v1129_v6 }
 0x140   : > { %v4247_v7 = vpop.permute.xlu1 %1712  ;;  %v4249_v22 = vpop.permute.xlu0 %1710 }
 0x142   : > { %3070 = vmatmul.mubr.msk.f32.gmra.mrb[54].mxu1 %vm1142_vm2, %v1130_v28 }
 0x144   : > { %v4251_v61 = vpop.permute.xlu1 %1564  ;;  %v4253_v56 = vpop.permute.xlu0 %1562 }
 0x148   : > { %v4255_v16 = vpop.permute.xlu1 %1716  ;;  %v4257_v38 = vpop.permute.xlu0 %1714 }
 0x14c   : > { %v4259_v29 = vpop.permute.xlu1 %1568  ;;  %v4261_v8 = vpop.permute.xlu0 %1566 }
 0x150   : > { %v4263_v39 = vpop.permute.xlu1 %1720  ;;  %v4265_v5 = vpop.permute.xlu0 %1718 }
 0x154   : > { %v4267_v1 = vpop.permute.xlu1 %1572  ;;  %v4269_v19 = vpop.permute.xlu0 %1570 }
 0x158   : > { %v4271_v24 = vpop.permute.xlu1 %1724  ;;  %v4273_v26 = vpop.permute.xlu0 %1722 }
 0x15c   : > { %v4275_v51 = vpop.permute.xlu1 %1576  ;;  %v4277_v30 = vpop.permute.xlu0 %1574 }
 0x160   : > { %v4279_v44 = vpop.permute.xlu1 %1728  ;;  %v4281_v11 = vpop.permute.xlu0 %1726 }
 0x164   : > { %v4283_v47 = vpop.permute.xlu1 %1580  ;;  %v4285_v4 = vpop.permute.xlu0 %1578 }
 0x168   : > { %v4287_v49 = vpop.permute.xlu1 %1732  ;;  %v4289_v60 = vpop.permute.xlu0 %1730 }
 0x16c   : > { %v4291_v50 = vpop.permute.xlu1 %1584  ;;  %v4293_v21 = vpop.permute.xlu0 %1582 }
 0x170   : > { %v4295_v63 = vpop.permute.xlu1 %1736  ;;  %v4297_v48 = vpop.permute.xlu0 %1734 }
 0x174   : > { %v4299_v27 = vpop.permute.xlu1 %1588  ;;  %v4301_v12 = vpop.permute.xlu0 %1586 }
 0x178   : > { %v4303_v31 = vpop.permute.xlu1 %1740  ;;  %v4305_v62 = vpop.permute.xlu0 %1738 }
 0x17c   : > { %v4307_v20 = vpop.permute.xlu1 %1592  ;;  %v4309_v10 = vpop.permute.xlu0 %1590 }
 0x180   : > { %v4311_v13 = vpop.permute.xlu1 %1744  ;;  %v4313_v14 = vpop.permute.xlu0 %1742 }
 0x184   : > { %v4315_v15 = vpop.permute.xlu1 %1596  ;;  %v4317_v43 = vpop.permute.xlu0 %1594 }
 0x188   : > { %v4319_v40 = vpop.permute.xlu1 %1748  ;;  %v4321_v54 = vpop.permute.xlu0 %1746 }
 0x189   : > { %4801 = vst [vmem:[#allocation3_spill] sm:$0xff] %v4319_v40  ;;  %4802 = vst [vmem:[#allocation6_spill] sm:$0xff] %v4321_v54 }
 0x18c   : > { %v4323_v59 = vpop.permute.xlu1 %1600  ;;  %v4325_v36 = vpop.permute.xlu0 %1598 }
 0x18d   : > { %4803 = vst [vmem:[#allocation7_spill] sm:$0xff] %v4323_v59  ;;  %4804 = vst [vmem:[#allocation5_spill] sm:$0xff] %v4325_v36 }
 0x190   : > { %v4334_v57 = vpop.permute.xlu1 %1752  ;;  %v4337_v42 = vpop.permute.xlu0 %1750 }
 0x191   : > { %4805 = vst [vmem:[#allocation4_spill] sm:$0xff] %v4334_v57 }
 0x194   : > { %v4342_v40 = vpop.permute.xlu1 %1604 }
 0x1cd   : > { %v3017_v0 = vpop.f32.mrb[18].mxu1 }
 0x1ce   : > { %v1329_v23 = vadd.f32 %v3017_v0, %v4330_v37  ;;  %v1323_v2 = vpop.f32.mrb[19].mxu1 }
 0x1cf   : > { %v1324_v32 = vadd.f32 %v4330_v37, %v1323_v2 }
 0x1d0   : > { %v1665_v33 = vmul.f32 %v4230_v52, %v1329_v23 }
 0x1d1   : > { %v1664_v58 = vmul.f32 %v4233_v17, %v1324_v32  ;;  %v3020_v34 = vpop.f32.mrb[20].mxu1  ;;  %v4346_v32 = vpop.permute.xlu0 %1602 }
 0x1d2   : > { %v1817_v6 = vadd.f32 %v1705_v55, %v1665_v33  ;;  %v1339_v18 = vadd.f32 %v3020_v34, %v4330_v37  ;;  %v1333_v45 = vpop.f32.mrb[21].mxu1 }
 0x1d3   : > { %v1816_v28 = vadd.f32 %v1703_v25, %v1664_v58  ;;  %v1334_v36 = vadd.f32 %v4330_v37, %v1333_v45 }
 0x1d4   : > { %v1667_v0 = vmul.f32 %v1557_v35, %v1339_v18  ;;  %v1855_v57 = vmax.f32 %v1817_v6, 0.0 }
 0x1d5   : > { %v1854_v59 = vmax.f32 %v1816_v28, 0.0  ;;  %v1666_v54 = vmul.f32 %v1555_v3, %v1334_v36  ;;  %v3023_v2 = vpop.f32.mrb[22].mxu1 }
 0x1d6   : > { %v1819_v52 = vadd.f32 %v4239_v41, %v1667_v0  ;;  %v1349_v23 = vadd.f32 %v3023_v2, %v4330_v37  ;;  %v1343_v17 = vpop.f32.mrb[23].mxu1 }
 0x1d7   : > { %v1818_v55 = vadd.f32 %v4241_v53, %v1666_v54  ;;  %v1344_v25 = vadd.f32 %v4330_v37, %v1343_v17  ;;  %3080 = vmatprep.mubr.msk.f32.mxu0 %vm1142_vm2, %v1854_v59  ;;  %v4359_v59 = vpop.permute.xlu1 %1756 }
 0x1d8   : > { %v1669_v35 = vmul.f32 %v4243_v46, %v1349_v23  ;;  %3081 = vmatmul.mubr.msk.f32.vlgmr.msra.gmra.mrb[20].mxu0 %vm1142_vm2, %v1855_v57  ;;  %v1857_v41 = vmax.f32 %v1819_v52, 0.0 }
 0x1d9   : > { %v1856_v3 = vmax.f32 %v1818_v55, 0.0  ;;  %v1668_v36 = vmul.f32 %v4245_v9, %v1344_v25  ;;  %v3026_v33 = vpop.f32.mrb[24].mxu1  ;;  %v4363_v9 = vpop.permute.xlu0 %1754 }
 0x1da   : > { %v1821_v58 = vadd.f32 %v4247_v7, %v1669_v35  ;;  %v1359_v34 = vadd.f32 %v3026_v33, %v4330_v37  ;;  %v1353_v6 = vpop.f32.mrb[25].mxu1 }
 0x1db   : > { %v1820_v53 = vadd.f32 %v4249_v22, %v1668_v36  ;;  %v1354_v54 = vadd.f32 %v4330_v37, %v1353_v6  ;;  %3083 = vmatprep.mubr.msk.f32.mxu0 %vm1142_vm2, %v1856_v3  ;;  %v4374_v55 = vpop.permute.xlu1 %1608 }
 0x1dc   : > { %v1671_v46 = vmul.f32 %v4251_v61, %v1359_v34  ;;  %3084 = vmatmul.mubr.msk.f32.gmra.mrb[22].mxu0 %vm1142_vm2, %v1857_v41  ;;  %v1859_v45 = vmax.f32 %v1821_v58, 0.0 }
 0x1dd   : > { %v1858_v57 = vmax.f32 %v1820_v53, 0.0  ;;  %v1670_v7 = vmul.f32 %v4253_v56, %v1354_v54  ;;  %v3029_v18 = vpop.f32.mrb[26].mxu1  ;;  %v4378_v3 = vpop.permute.xlu0 %1606 }
 0x1de   : > { %v1823_v28 = vadd.f32 %v4255_v16, %v1671_v46  ;;  %v1369_v22 = vadd.f32 %v3029_v18, %v4330_v37  ;;  %v1363_v0 = vpop.f32.mrb[27].mxu1 }
 0x1df   : > { %v1822_v2 = vadd.f32 %v4257_v38, %v1670_v7  ;;  %v1364_v52 = vadd.f32 %v4330_v37, %v1363_v0  ;;  %3086 = vmatprep.mubr.msk.f32.mxu0 %vm1142_vm2, %v1858_v57  ;;  %v4391_v46 = vpop.permute.xlu1 %1760 }
 0x1e0   : > { %v1673_v61 = vmul.f32 %v4259_v29, %v1369_v22  ;;  %3087 = vmatmul.mubr.msk.f32.gmra.mrb[24].mxu0 %vm1142_vm2, %v1859_v45  ;;  %v1861_v16 = vmax.f32 %v1823_v28, 0.0 }
 0x1e1   : > { %v1860_v23 = vmax.f32 %v1822_v2, 0.0  ;;  %v1672_v56 = vmul.f32 %v4261_v8, %v1364_v52  ;;  %v3032_v17 = vpop.f32.mrb[28].mxu1 }
 0x1e2   : > { %v1825_v25 = vadd.f32 %v4263_v39, %v1673_v61  ;;  %v1379_v35 = vadd.f32 %v3032_v17, %v4330_v37  ;;  %v1373_v38 = vpop.f32.mrb[29].mxu1 }
 0x1e3   : > { %v1824_v36 = vadd.f32 %v4265_v5, %v1672_v56  ;;  %v1374_v29 = vadd.f32 %v4330_v37, %v1373_v38  ;;  %3089 = vmatprep.mubr.msk.f32.mxu0 %vm1142_vm2, %v1860_v23  ;;  %v4406_v61 = vpop.permute.xlu1 %1612 }
 0x1e4   : > { %v1675_v33 = vmul.f32 %v4267_v1, %v1379_v35  ;;  %3090 = vmatmul.mubr.msk.f32.gmra.mrb[26].mxu0 %vm1142_vm2, %v1861_v16  ;;  %v1863_v39 = vmax.f32 %v1825_v25, 0.0 }
 0x1e5   : > { %v1862_v8 = vmax.f32 %v1824_v36, 0.0  ;;  %v1674_v41 = vmul.f32 %v4269_v19, %v1374_v29  ;;  %v3035_v58 = vpop.f32.mrb[30].mxu1  ;;  %v4395_v19 = vpop.permute.xlu0 %1758 }
 0x1e6   : > { %v1827_v34 = vadd.f32 %v4271_v24, %v1675_v33  ;;  %v1389_v6 = vadd.f32 %v3035_v58, %v4330_v37  ;;  %v1383_v53 = vpop.f32.mrb[31].mxu1 }
 0x1e7   : > { %v1826_v5 = vadd.f32 %v4273_v26, %v1674_v41  ;;  %v1384_v54 = vadd.f32 %v4330_v37, %v1383_v53  ;;  %3092 = vmatprep.mubr.msk.f32.mxu0 %vm1142_vm2, %v1862_v8  ;;  %v4423_v41 = vpop.permute.xlu1 %1764 }
 0x1e8   : > { %v1677_v1 = vmul.f32 %v4275_v51, %v1389_v6  ;;  %3093 = vmatmul.mubr.msk.f32.gmra.mrb[28].mxu0 %vm1142_vm2, %v1863_v39  ;;  %v1865_v18 = vmax.f32 %v1827_v34, 0.0 }
 0x1e9   : > { %v1864_v57 = vmax.f32 %v1826_v5, 0.0  ;;  %v1676_v24 = vmul.f32 %v4277_v30, %v1384_v54  ;;  %v3038_v7 = vpop.f32.mrb[32].mxu1  ;;  %v4410_v17 = vpop.permute.xlu0 %1610 }
 0x1ea   : > { %v1829_v45 = vadd.f32 %v4279_v44, %v1677_v1  ;;  %v1399_v26 = vadd.f32 %v3038_v7, %v4330_v37  ;;  %v1393_v28 = vpop.f32.mrb[33].mxu1 }
 0x1eb   : > { %v1828_v22 = vadd.f32 %v4281_v11, %v1676_v24  ;;  %v1394_v0 = vadd.f32 %v4330_v37, %v1393_v28  ;;  %3095 = vmatprep.mubr.msk.f32.mxu0 %vm1142_vm2, %v1864_v57  ;;  %v4438_v24 = vpop.permute.xlu1 %1616 }
 0x1ec   : > { %v1679_v51 = vmul.f32 %v4283_v47, %v1399_v26  ;;  %3096 = vmatmul.mubr.msk.f32.gmra.mrb[30].mxu0 %vm1142_vm2, %v1865_v18  ;;  %v1867_v44 = vmax.f32 %v1829_v45, 0.0 }
 0x1ed   : > { %v1866_v2 = vmax.f32 %v1828_v22, 0.0  ;;  %v1678_v30 = vmul.f32 %v4285_v4, %v1394_v0  ;;  %v3041_v52 = vpop.f32.mrb[34].mxu1 }
 0x1ee   : > { %v1831_v23 = vadd.f32 %v4287_v49, %v1679_v51  ;;  %v1409_v56 = vadd.f32 %v3041_v52, %v4330_v37  ;;  %v1403_v11 = vpop.f32.mrb[35].mxu1  ;;  %v4806_v51 = vld [vmem:[#allocation3_spill] sm:$0xff] }
 0x1ef   : > { %v1830_v16 = vadd.f32 %v4289_v60, %v1678_v30  ;;  %v1404_v47 = vadd.f32 %v4330_v37, %v1403_v11  ;;  %3098 = vmatprep.mubr.msk.f32.mxu0 %vm1142_vm2, %v1866_v2 }
 0x1f0   : > { %v1681_v25 = vmul.f32 %v4291_v50, %v1409_v56  ;;  %3099 = vmatmul.mubr.msk.f32.gmra.mrb[32].mxu0 %vm1142_vm2, %v1867_v44  ;;  %v1869_v49 = vmax.f32 %v1831_v23, 0.0  ;;  %v4807_v44 = vld [vmem:[#allocation6_spill] sm:$0xff]  ;;  %v1769_v56 = vpop.permute.xlu1 %1768 }
 0x1f1   : > { %v1868_v4 = vmax.f32 %v1830_v16, 0.0  ;;  %v1680_v35 = vmul.f32 %v4293_v21, %v1404_v47  ;;  %v3044_v38 = vpop.f32.mrb[36].mxu1  ;;  %v4427_v21 = vpop.permute.xlu0 %1762  ;;  %v4809_v47 = vld [vmem:[#allocation5_spill] sm:$0xff] }
 0x1f2   : > { %v1833_v36 = vadd.f32 %v4295_v63, %v1681_v25  ;;  %v1419_v29 = vadd.f32 %v3044_v38, %v4330_v37  ;;  %v1413_v33 = vpop.f32.mrb[37].mxu1  ;;  %v4810_v38 = vld [vmem:[#allocation4_spill] sm:$0xff] }
 0x1f3   : > { %v1832_v60 = vadd.f32 %v4297_v48, %v1680_v35  ;;  %v1414_v8 = vadd.f32 %v4330_v37, %v1413_v33  ;;  %3101 = vmatprep.mubr.msk.f32.mxu0 %vm1142_vm2, %v1868_v4 }
 0x1f4   : > { %v1683_v50 = vmul.f32 %v4299_v27, %v1419_v29  ;;  %3102 = vmatmul.mubr.msk.f32.gmra.mrb[34].mxu0 %vm1142_vm2, %v1869_v49  ;;  %v1871_v34 = vmax.f32 %v1833_v36, 0.0 }
 0x1f5   : > { %v1870_v58 = vmax.f32 %v1832_v60, 0.0  ;;  %v1682_v63 = vmul.f32 %v4301_v12, %v1414_v8  ;;  %v3047_v39 = vpop.f32.mrb[38].mxu1  ;;  %v4442_v45 = vpop.permute.xlu0 %1614 }
 0x1f6   : > { %v1835_v6 = vadd.f32 %v4303_v31, %v1683_v50  ;;  %v1429_v48 = vadd.f32 %v3047_v39, %v4330_v37  ;;  %v1423_v53 = vpop.f32.mrb[39].mxu1  ;;  %v1621_v39 = vpop.permute.xlu1 %1620 }
 0x1f7   : > { %v1834_v5 = vadd.f32 %v4305_v62, %v1682_v63  ;;  %v1424_v54 = vadd.f32 %v4330_v37, %v1423_v53  ;;  %3104 = vmatprep.mubr.msk.f32.mxu0 %vm1142_vm2, %v1870_v58 }
 0x1f8   : > { %v1685_v27 = vmul.f32 %v4307_v20, %v1429_v48  ;;  %3105 = vmatmul.mubr.msk.f32.gmra.mrb[36].mxu0 %vm1142_vm2, %v1871_v34  ;;  %v1873_v31 = vmax.f32 %v1835_v6, 0.0 }
 0x1f9   : > { %v1872_v1 = vmax.f32 %v1834_v5, 0.0  ;;  %v1684_v12 = vmul.f32 %v4309_v10, %v1424_v54  ;;  %v3050_v57 = vpop.f32.mrb[40].mxu1  ;;  %v1767_v16 = vpop.permute.xlu0 %1766 }
 0x1fa   : > { %v1837_v7 = vadd.f32 %v4311_v13, %v1685_v27  ;;  %v1439_v18 = vadd.f32 %v3050_v57, %v4330_v37  ;;  %v1433_v62 = vpop.f32.mrb[41].mxu1 }
 0x1fb   : > { %v1836_v26 = vadd.f32 %v4313_v14, %v1684_v12  ;;  %v1434_v20 = vadd.f32 %v4330_v37, %v1433_v62  ;;  %3107 = vmatprep.mubr.msk.f32.mxu0 %vm1142_vm2, %v1872_v1 }
 0x1fc   : > { %v1687_v28 = vmul.f32 %v4315_v15, %v1439_v18  ;;  %3108 = vmatmul.mubr.msk.f32.gmra.mrb[38].mxu0 %vm1142_vm2, %v1873_v31  ;;  %v1875_v13 = vmax.f32 %v1837_v7, 0.0  ;;  %v4808_v15 = vld [vmem:[#allocation7_spill] sm:$0xff]  ;;  %v1773_v18 = vpop.permute.xlu1 %1772 }
 0x1fd   : > { %v1874_v10 = vmax.f32 %v1836_v26, 0.0  ;;  %v1686_v22 = vmul.f32 %v4317_v43, %v1434_v20  ;;  %v3053_v0 = vpop.f32.mrb[42].mxu1 }
 0x1fe   : > { %v1839_v2 = vadd.f32 %v4806_v51, %v1687_v28  ;;  %v1449_v30 = vadd.f32 %v3053_v0, %v4330_v37  ;;  %v1443_v52 = vpop.f32.mrb[43].mxu1 }
 0x1ff   : > { %v1838_v14 = vadd.f32 %v4807_v44, %v1686_v22  ;;  %v1444_v23 = vadd.f32 %v4330_v37, %v1443_v52  ;;  %3110 = vmatprep.mubr.msk.f32.mxu0 %vm1142_vm2, %v1874_v10 }
 0x200   : > { %v1689_v11 = vmul.f32 %v4808_v15, %v1449_v30  ;;  %3111 = vmatmul.mubr.msk.f32.gmra.mrb[40].mxu0 %vm1142_vm2, %v1875_v13  ;;  %v1877_v35 = vmax.f32 %v1839_v2, 0.0  ;;  %v1625_v2 = vpop.permute.xlu1 %1624 }
 0x201   : > { %v1876_v43 = vmax.f32 %v1838_v14, 0.0  ;;  %v1688_v25 = vmul.f32 %v4809_v47, %v1444_v23  ;;  %v3056_v4 = vpop.f32.mrb[44].mxu1 }
 0x202   : > { %v1841_v49 = vadd.f32 %v4810_v38, %v1689_v11  ;;  %v1459_v36 = vadd.f32 %v3056_v4, %v4330_v37  ;;  %v1453_v29 = vpop.f32.mrb[45].mxu1 }
 0x203   : > { %v1840_v33 = vadd.f32 %v4337_v42, %v1688_v25  ;;  %v1454_v60 = vadd.f32 %v4330_v37, %v1453_v29  ;;  %3113 = vmatprep.mubr.msk.f32.mxu0 %vm1142_vm2, %v1876_v43  ;;  %v1619_v42 = vpop.permute.xlu0 %1618 }
 0x204   : > { %v1691_v8 = vmul.f32 %v4342_v40, %v1459_v36  ;;  %3114 = vmatmul.mubr.msk.f32.gmra.mrb[42].mxu0 %vm1142_vm2, %v1877_v35  ;;  %v1879_v34 = vmax.f32 %v1841_v49, 0.0 }
 0x205   : > { %v1878_v50 = vmax.f32 %v1840_v33, 0.0  ;;  %v1690_v58 = vmul.f32 %v4346_v32, %v1454_v60  ;;  %v3059_v63 = vpop.f32.mrb[46].mxu1 }
 0x206   : > { %v1843_v6 = vadd.f32 %v4359_v59, %v1691_v8  ;;  %v1469_v48 = vadd.f32 %v3059_v63, %v4330_v37  ;;  %v1463_v53 = vpop.f32.mrb[47].mxu1 }
 0x207   : > { %v1842_v5 = vadd.f32 %v4363_v9, %v1690_v58  ;;  %v1464_v54 = vadd.f32 %v4330_v37, %v1463_v53  ;;  %3116 = vmatprep.mubr.msk.f32.mxu0 %vm1142_vm2, %v1878_v50  ;;  %v1771_v62 = vpop.permute.xlu0 %1770 }
 0x208   : > { %v1693_v40 = vmul.f32 %v4374_v55, %v1469_v48  ;;  %3117 = vmatmul.mubr.msk.f32.gmra.mrb[44].mxu0 %vm1142_vm2, %v1879_v34  ;;  %v1881_v12 = vmax.f32 %v1843_v6, 0.0 }
 0x209   : > { %v1880_v32 = vmax.f32 %v1842_v5, 0.0  ;;  %v1692_v27 = vmul.f32 %v4378_v3, %v1464_v54  ;;  %v3062_v1 = vpop.f32.mrb[48].mxu1 }
 0x20a   : > { %v1845_v59 = vadd.f32 %v4391_v46, %v1693_v40  ;;  %v1479_v57 = vadd.f32 %v3062_v1, %v4330_v37  ;;  %v1473_v31 = vpop.f32.mrb[49].mxu1 }
 0x20b   : > { %v1844_v9 = vadd.f32 %v4395_v19, %v1692_v27  ;;  %v1474_v7 = vadd.f32 %v4330_v37, %v1473_v31  ;;  %3119 = vmatprep.mubr.msk.f32.mxu0 %vm1142_vm2, %v1880_v32  ;;  %v1623_v14 = vpop.permute.xlu0 %1622 }
 0x20c   : > { %v1695_v55 = vmul.f32 %v4406_v61, %v1479_v57  ;;  %3120 = vmatmul.mubr.msk.f32.gmra.mrb[46].mxu0 %vm1142_vm2, %v1881_v12  ;;  %v1883_v46 = vmax.f32 %v1845_v59, 0.0 }
 0x20d   : > { %v1882_v3 = vmax.f32 %v1844_v9, 0.0  ;;  %v1694_v26 = vmul.f32 %v4410_v17, %v1474_v7  ;;  %v3065_v20 = vpop.f32.mrb[50].mxu1 }
 0x20e   : > { %v1847_v28 = vadd.f32 %v4423_v41, %v1695_v55  ;;  %v1489_v10 = vadd.f32 %v3065_v20, %v4330_v37  ;;  %v1483_v19 = vpop.f32.mrb[51].mxu1 }
 0x20f   : > { %v1846_v22 = vadd.f32 %v4427_v21, %v1694_v26  ;;  %v1484_v0 = vadd.f32 %v4330_v37, %v1483_v19  ;;  %3122 = vmatprep.mubr.msk.f32.mxu0 %vm1142_vm2, %v1882_v3  ;;  %v1775_v49 = vpop.permute.xlu0 %1774 }
 0x210   : > { %v1697_v61 = vmul.f32 %v4438_v24, %v1489_v10  ;;  %3123 = vmatmul.mubr.msk.f32.gmra.mrb[48].mxu0 %vm1142_vm2, %v1883_v46  ;;  %v1885_v30 = vmax.f32 %v1847_v28, 0.0 }
 0x211   : > { %v1884_v13 = vmax.f32 %v1846_v22, 0.0  ;;  %v1696_v17 = vmul.f32 %v4442_v45, %v1484_v0  ;;  %v3068_v51 = vpop.f32.mrb[52].mxu1 }
 0x212   : > { %v1849_v41 = vadd.f32 %v1769_v56, %v1697_v61  ;;  %v1499_v52 = vadd.f32 %v3068_v51, %v4330_v37  ;;  %v1493_v44 = vpop.f32.mrb[53].mxu1 }
 0x213   : > { %v1848_v21 = vadd.f32 %v1767_v16, %v1696_v17  ;;  %v1494_v23 = vadd.f32 %v4330_v37, %v1493_v44  ;;  %3125 = vmatprep.mubr.msk.f32.mxu0 %vm1142_vm2, %v1884_v13  ;;  %v1777_v16 = vpop.permute.xlu1 %1776 }
 0x214   : > { %v1699_v15 = vmul.f32 %v1621_v39, %v1499_v52  ;;  %3126 = vmatmul.mubr.msk.f32.gmra.mrb[50].mxu0 %vm1142_vm2, %v1885_v30  ;;  %v1887_v45 = vmax.f32 %v1849_v41, 0.0 }
 0x215   : > { %v1886_v24 = vmax.f32 %v1848_v21, 0.0  ;;  %v1698_v11 = vmul.f32 %v1619_v42, %v1494_v23  ;;  %v3071_v43 = vpop.f32.mrb[54].mxu1 }
 0x216   : > { %v1851_v47 = vadd.f32 %v1773_v18, %v1699_v15  ;;  %v1509_v25 = vadd.f32 %v3071_v43, %v4330_v37  ;;  %v1503_v56 = vpop.f32.mrb[55].mxu1 }
 0x217   : > { %v1850_v4 = vadd.f32 %v1771_v62, %v1698_v11  ;;  %v1504_v35 = vadd.f32 %v4330_v37, %v1503_v56  ;;  %3128 = vmatprep.mubr.msk.f32.mxu0 %vm1142_vm2, %v1886_v24  ;;  %v4506_v37 = vld [vmem:[%s4780_s7] ss:$0 sm:$0xff] }
 0x218   : > { %3129 = vmatmul.mubr.msk.f32.gmra.mrb[52].mxu0 %vm1142_vm2, %v1887_v45  ;;  %v1701_v38 = vmul.f32 %v1625_v2, %v1509_v25  ;;  %v1889_v33 = vmax.f32 %v1851_v47, 0.0 }
 0x219   : > { %v1888_v36 = vmax.f32 %v1850_v4, 0.0  ;;  %v1700_v29 = vmul.f32 %v1623_v14, %v1504_v35 }
 0x21a   : > { %v1853_v60 = vadd.f32 %v1777_v16, %v1701_v38 }
 0x21b   : > { %v1852_v8 = vadd.f32 %v1775_v49, %v1700_v29  ;;  %3131 = vmatprep.mubr.msk.f32.mxu0 %vm1142_vm2, %v1888_v36 }
 0x21c   : > { %3132 = vmatmul.mubr.msk.f32.gmra.mrb[54].mxu0 %vm1142_vm2, %v1889_v33  ;;  %v1891_v58 = vmax.f32 %v1853_v60, 0.0 }
 0x21d   : > { %v1890_v50 = vmax.f32 %v1852_v8, 0.0 }
 0x21f   : > { %3134 = vmatprep.mubr.msk.f32.mxu0 %vm1142_vm2, %v1890_v50 }
 0x220   : > { %3135 = vmatmul.mubr.msk.f32.gmra.mrb[56].mxu0 %vm1142_vm2, %v1891_v58 }
 0x2ab   : > { %v3082_v63 = vpop.f32.mrb[20].mxu0 }
 0x2ac   : > { %v2089_v39 = vadd.f32 %v3082_v63, %v4506_v37  ;;  %v2083_v34 = vpop.f32.mrb[21].mxu0 }
 0x2ad   : > { %v2084_v6 = vadd.f32 %v4506_v37, %v2083_v34 }
 0x2ae   : > { %2274 = vst.msk [vmem:[%s4510_s22 + $0x8] sm:$0xff] %vm2272_vm3, %v2089_v39 }
 0x2af   : > { %2273 = vst.msk [vmem:[%s4510_s22] sm:$0xff] %vm2272_vm3, %v2084_v6  ;;  %v3085_v48 = vpop.f32.mrb[22].mxu0 }
 0x2b0   : > { %v2099_v53 = vadd.f32 %v3085_v48, %v4506_v37  ;;  %v2093_v42 = vpop.f32.mrb[23].mxu0 }
 0x2b1   : > { %v2094_v5 = vadd.f32 %v4506_v37, %v2093_v42 }
 0x2b2   : > { %2276 = vst.msk [vmem:[%s4510_s22 + $0x18] sm:$0xff] %vm2272_vm3, %v2099_v53 }
 0x2b3   : > { %2275 = vst.msk [vmem:[%s4510_s22 + $0x10] sm:$0xff] %vm2272_vm3, %v2094_v5  ;;  %v3088_v54 = vpop.f32.mrb[24].mxu0 }
 0x2b4   : > { %v2109_v40 = vadd.f32 %v3088_v54, %v4506_v37  ;;  %v2103_v32 = vpop.f32.mrb[25].mxu0 }
 0x2b5   : > { %v2104_v27 = vadd.f32 %v4506_v37, %v2103_v32 }
 0x2b6   : > { %2278 = vst.msk [vmem:[%s4510_s22 + $0x28] sm:$0xff] %vm2272_vm3, %v2109_v40 }
 0x2b7   : > { %2277 = vst.msk [vmem:[%s4510_s22 + $0x20] sm:$0xff] %vm2272_vm3, %v2104_v27  ;;  %v3091_v1 = vpop.f32.mrb[26].mxu0 }
 0x2b8   : > { %v2119_v12 = vadd.f32 %v3091_v1, %v4506_v37  ;;  %v2113_v59 = vpop.f32.mrb[27].mxu0 }
 0x2b9   : > { %v2114_v57 = vadd.f32 %v4506_v37, %v2113_v59 }
 0x2ba   : > { %2280 = vst.msk [vmem:[%s4510_s22 + $0x38] sm:$0xff] %vm2272_vm3, %v2119_v12 }
 0x2bb   : > { %2279 = vst.msk [vmem:[%s4510_s22 + $0x30] sm:$0xff] %vm2272_vm3, %v2114_v57  ;;  %v3094_v31 = vpop.f32.mrb[28].mxu0 }
 0x2bc   : > { %v2129_v9 = vadd.f32 %v3094_v31, %v4506_v37  ;;  %v2123_v7 = vpop.f32.mrb[29].mxu0 }
 0x2bd   : > { %v2124_v18 = vadd.f32 %v4506_v37, %v2123_v7 }
 0x2be   : > { %2282 = vst.msk [vmem:[%s4510_s22 + $0x48] sm:$0xff] %vm2272_vm3, %v2129_v9 }
 0x2bf   : > { %2281 = vst.msk [vmem:[%s4510_s22 + $0x40] sm:$0xff] %vm2272_vm3, %v2124_v18  ;;  %v3097_v55 = vpop.f32.mrb[30].mxu0 }
 0x2c0   : > { %v2139_v62 = vadd.f32 %v3097_v55, %v4506_v37  ;;  %v2133_v3 = vpop.f32.mrb[31].mxu0 }
 0x2c1   : > { %v2134_v26 = vadd.f32 %v4506_v37, %v2133_v3 }
 0x2c2   : > { %2284 = vst.msk [vmem:[%s4510_s22 + $0x58] sm:$0xff] %vm2272_vm3, %v2139_v62 }
 0x2c3   : > { %2283 = vst.msk [vmem:[%s4510_s22 + $0x50] sm:$0xff] %vm2272_vm3, %v2134_v26  ;;  %v3100_v20 = vpop.f32.mrb[32].mxu0 }
 0x2c4   : > { %v2149_v46 = vadd.f32 %v3100_v20, %v4506_v37  ;;  %v2143_v28 = vpop.f32.mrb[33].mxu0 }
 0x2c5   : > { %v2144_v10 = vadd.f32 %v4506_v37, %v2143_v28 }
 0x2c6   : > { %2286 = vst.msk [vmem:[%s4510_s22 + $0x68] sm:$0xff] %vm2272_vm3, %v2149_v46 }
 0x2c7   : > { %2285 = vst.msk [vmem:[%s4510_s22 + $0x60] sm:$0xff] %vm2272_vm3, %v2144_v10  ;;  %v3103_v19 = vpop.f32.mrb[34].mxu0 }
 0x2c8   : > { %v2159_v22 = vadd.f32 %v3103_v19, %v4506_v37  ;;  %v2153_v0 = vpop.f32.mrb[35].mxu0 }
 0x2c9   : > { %v2154_v61 = vadd.f32 %v4506_v37, %v2153_v0 }
 0x2ca   : > { %2288 = vst.msk [vmem:[%s4510_s22 + $0x78] sm:$0xff] %vm2272_vm3, %v2159_v22 }
 0x2cb   : > { %2287 = vst.msk [vmem:[%s4510_s22 + $0x70] sm:$0xff] %vm2272_vm3, %v2154_v61  ;;  %v3106_v13 = vpop.f32.mrb[36].mxu0 }
 0x2cc   : > { %v2169_v17 = vadd.f32 %v3106_v13, %v4506_v37  ;;  %v2163_v51 = vpop.f32.mrb[37].mxu0 }
 0x2cd   : > { %v2164_v2 = vadd.f32 %v4506_v37, %v2163_v51 }
 0x2ce   : > { %2290 = vst.msk [vmem:[%s4510_s22 + $0x88] sm:$0xff] %vm2272_vm3, %v2169_v17 }
 0x2cf   : > { %2289 = vst.msk [vmem:[%s4510_s22 + $0x80] sm:$0xff] %vm2272_vm3, %v2164_v2  ;;  %v3109_v30 = vpop.f32.mrb[38].mxu0 }
 0x2d0   : > { %v2179_v41 = vadd.f32 %v3109_v30, %v4506_v37  ;;  %v2173_v52 = vpop.f32.mrb[39].mxu0 }
 0x2d1   : > { %v2174_v44 = vadd.f32 %v4506_v37, %v2173_v52 }
 0x2d2   : > { %2292 = vst.msk [vmem:[%s4510_s22 + $0x98] sm:$0xff] %vm2272_vm3, %v2179_v41 }
 0x2d3   : > { %2291 = vst.msk [vmem:[%s4510_s22 + $0x90] sm:$0xff] %vm2272_vm3, %v2174_v44  ;;  %v3112_v14 = vpop.f32.mrb[40].mxu0 }
 0x2d4   : > { %v2189_v21 = vadd.f32 %v3112_v14, %v4506_v37  ;;  %v2183_v23 = vpop.f32.mrb[41].mxu0 }
 0x2d5   : > { %v2184_v15 = vadd.f32 %v4506_v37, %v2183_v23 }
 0x2d6   : > { %2294 = vst.msk [vmem:[%s4510_s22 + $0xa8] sm:$0xff] %vm2272_vm3, %v2189_v21 }
 0x2d7   : > { %2293 = vst.msk [vmem:[%s4510_s22 + $0xa0] sm:$0xff] %vm2272_vm3, %v2184_v15  ;;  %v3115_v24 = vpop.f32.mrb[42].mxu0 }
 0x2d8   : > { %v2199_v11 = vadd.f32 %v3115_v24, %v4506_v37  ;;  %v2193_v43 = vpop.f32.mrb[43].mxu0 }
 0x2d9   : > { %v2194_v45 = vadd.f32 %v4506_v37, %v2193_v43 }
 0x2da   : > { %2296 = vst.msk [vmem:[%s4510_s22 + $0xb8] sm:$0xff] %vm2272_vm3, %v2199_v11 }
 0x2db   : > { %2295 = vst.msk [vmem:[%s4510_s22 + $0xb0] sm:$0xff] %vm2272_vm3, %v2194_v45  ;;  %v3118_v47 = vpop.f32.mrb[44].mxu0 }
 0x2dc   : > { %v2209_v25 = vadd.f32 %v3118_v47, %v4506_v37  ;;  %v2203_v56 = vpop.f32.mrb[45].mxu0 }
 0x2dd   : > { %v2204_v4 = vadd.f32 %v4506_v37, %v2203_v56 }
 0x2de   : > { %2298 = vst.msk [vmem:[%s4510_s22 + $0xc8] sm:$0xff] %vm2272_vm3, %v2209_v25 }
 0x2df   : > { %2297 = vst.msk [vmem:[%s4510_s22 + $0xc0] sm:$0xff] %vm2272_vm3, %v2204_v4  ;;  %v3121_v35 = vpop.f32.mrb[46].mxu0 }
 0x2e0   : > { %v2219_v16 = vadd.f32 %v3121_v35, %v4506_v37  ;;  %v2213_v38 = vpop.f32.mrb[47].mxu0 }
 0x2e1   : > { %v2214_v49 = vadd.f32 %v4506_v37, %v2213_v38 }
 0x2e2   : > { %2300 = vst.msk [vmem:[%s4510_s22 + $0xd8] sm:$0xff] %vm2272_vm3, %v2219_v16 }
 0x2e3   : > { %2299 = vst.msk [vmem:[%s4510_s22 + $0xd0] sm:$0xff] %vm2272_vm3, %v2214_v49  ;;  %v3124_v36 = vpop.f32.mrb[48].mxu0 }
 0x2e4   : > { %v2229_v29 = vadd.f32 %v3124_v36, %v4506_v37  ;;  %v2223_v33 = vpop.f32.mrb[49].mxu0 }
 0x2e5   : > { %v2224_v60 = vadd.f32 %v4506_v37, %v2223_v33 }
 0x2e6   : > { %2302 = vst.msk [vmem:[%s4510_s22 + $0xe8] sm:$0xff] %vm2272_vm3, %v2229_v29 }
 0x2e7   : > { %2301 = vst.msk [vmem:[%s4510_s22 + $0xe0] sm:$0xff] %vm2272_vm3, %v2224_v60  ;;  %v3127_v8 = vpop.f32.mrb[50].mxu0 }
 0x2e8   : > { %v2239_v50 = vadd.f32 %v3127_v8, %v4506_v37  ;;  %v2233_v58 = vpop.f32.mrb[51].mxu0 }
 0x2e9   : > { %v2234_v63 = vadd.f32 %v4506_v37, %v2233_v58 }
 0x2ea   : > { %2304 = vst.msk [vmem:[%s4510_s22 + $0xf8] sm:$0xff] %vm2272_vm3, %v2239_v50 }
 0x2eb   : > { %2303 = vst.msk [vmem:[%s4510_s22 + $0xf0] sm:$0xff] %vm2272_vm3, %v2234_v63  ;;  %v3130_v39 = vpop.f32.mrb[52].mxu0 }
 0x2ec   : > { %v2249_v34 = vadd.f32 %v3130_v39, %v4506_v37  ;;  %v2243_v6 = vpop.f32.mrb[53].mxu0 }
 0x2ed   : > { %v2244_v48 = vadd.f32 %v4506_v37, %v2243_v6 }
 0x2ee   : > { %2306 = vst.msk [vmem:[%s4510_s22 + $0x108] sm:$0xff] %vm2272_vm3, %v2249_v34 }
 0x2ef   : > { %2305 = vst.msk [vmem:[%s4510_s22 + $0x100] sm:$0xff] %vm2272_vm3, %v2244_v48  ;;  %v3133_v53 = vpop.f32.mrb[54].mxu0 }
 0x2f0   : > { %v2259_v42 = vadd.f32 %v3133_v53, %v4506_v37  ;;  %v2253_v5 = vpop.f32.mrb[55].mxu0 }
 0x2f1   : > { %v2254_v54 = vadd.f32 %v4506_v37, %v2253_v5  ;;  %2317 = sbr.rel (!%p3413_p4) target bundleno = 831 (0x33f), region = 56 }
 0x2f2   : > { %2308 = vst.msk [vmem:[%s4510_s22 + $0x118] sm:$0xff] %vm2272_vm3, %v2259_v42 }
 0x2f3   : > { %2307 = vst.msk [vmem:[%s4510_s22 + $0x110] sm:$0xff] %vm2272_vm3, %v2254_v54  ;;  %v3136_v40 = vpop.f32.mrb[56].mxu0 }
 0x2f4   : > { %v2269_v32 = vadd.f32 %v3136_v40, %v4506_v37  ;;  %v2263_v27 = vpop.f32.mrb[57].mxu0 }
 0x2f5   : > { %v2264_v1 = vadd.f32 %v4506_v37, %v2263_v27 }
 0x2f6   : > { %2310 = vst.msk [vmem:[%s4510_s22 + $0x128] sm:$0xff] %vm2272_vm3, %v2269_v32 }
 0x2f7   : > { %2309 = vst.msk [vmem:[%s4510_s22 + $0x120] sm:$0xff] %vm2272_vm3, %v2264_v1 }
 0x2f8   : > { %s4820_s27 = smov (!%p2320_p8, %s2319_s27), 38 }
 0x2f9   : > { %s2812_s29 = sshll.u32 %s4820_s27, 7 }
 0x2fa   : > { %p2815_p9 = scmp.eq.s32.totalorder %s2812_s29, 0 }
 0x2fb   : > { %3248 = sdivrem.u32 (!%p2815_p9), %s4820_s27, 38 }
 0x2fc   : > { %2328 = sbr.rel (%p2815_p9) target bundleno = 831 (0x33f), region = 60 }
 0x304   : > { %s4637_s13 = spop.drf %3248 }
 0x305   : > { %p2816_p10 = scmp.le.s32.totalorder %s4637_s13, 0 }
 0x306   : > { %s4811_s30 = smov (!%p2816_p10), %s4631_s26  ;;  %s4812_s16 = smov (!%p2816_p10), %s4510_s22 }
 0x307   : > { %2638 = sbr.rel (%p2816_p10) target bundleno = 802 (0x322), region = 139  ;;  %s4646_s10 = smov (!%p2816_p10), 0  }
 0x308   : > { %s4648_s11 = smov (!%p2816_p10), 0  }
 0x30e LB: >> { %v2466_v37 = vld [vmem:[%s3314_s16] sm:$0xff]  ;;  %v2468_v12 = vld [vmem:[%s3314_s16 + $0x8] sm:$0xff]  ;;  %v2470_v59 = vld [vmem:[%s3314_s16 + $0x10] sm:$0xff]  ;;  %s2542_s14 = sadd.s32 1, %s3318_s10  ;;  %s2460_s11 = sadd.s32 1, %s3322_s11   ;;  %s3322_s11 = sphi %s4648_s11, %s2460_s11   ;;  %s3318_s10 = sphi %s4646_s10, %s4815_s10   ;;  %s3314_s16 = sphi %s4812_s16, %s4814_s16   ;;  %s3310_s30 = sphi %s4811_s30, %s4813_s30  }
 0x30f   : >> { %2467 = vst [vmem:[%s3310_s30] sm:$0xff] %v2466_v37  ;;  %2469 = vst [vmem:[%s3310_s30 + $0x8] sm:$0xff] %v2468_v12  ;;  %v2472_v57 = vld [vmem:[%s3314_s16 + $0x18] sm:$0xff]  ;;  %v2474_v31 = vld [vmem:[%s3314_s16 + $0x20] sm:$0xff]  ;;  %p2543_p11 = scmp.ge.s32.totalorder %s2542_s14, %s4637_s13  ;;  %p2459_p12 = scmp.ge.s32.totalorder %s2460_s11, %s4637_s13 }
 0x310   : >> { %2471 = vst [vmem:[%s3310_s30 + $0x10] sm:$0xff] %v2470_v59  ;;  %v2476_v9 = vld [vmem:[%s3314_s16 + $0x28] sm:$0xff]  ;;  %2473 = vst [vmem:[%s3310_s30 + $0x18] sm:$0xff] %v2472_v57  ;;  %v2478_v7 = vld [vmem:[%s3314_s16 + $0x30] sm:$0xff] }
 0x311   : >> { %2475 = vst [vmem:[%s3310_s30 + $0x20] sm:$0xff] %v2474_v31  ;;  %2477 = vst [vmem:[%s3310_s30 + $0x28] sm:$0xff] %v2476_v9  ;;  %v2480_v18 = vld [vmem:[%s3314_s16 + $0x38] sm:$0xff]  ;;  %v2482_v55 = vld [vmem:[%s3314_s16 + $0x40] sm:$0xff]  ;;  %s4822_s14 = smov (%p2543_p11, %s2542_s14), 0 }
 0x312   : >> { %2479 = vst [vmem:[%s3310_s30 + $0x30] sm:$0xff] %v2478_v7  ;;  %2481 = vst [vmem:[%s3310_s30 + $0x38] sm:$0xff] %v2480_v18  ;;  %v2484_v62 = vld [vmem:[%s3314_s16 + $0x48] sm:$0xff]  ;;  %v2486_v3 = vld [vmem:[%s3314_s16 + $0x50] sm:$0xff]  ;;  %s2545_s15 = smul.u32 304, %s4822_s14  ;;  %s4815_s10 = smov %s4822_s14 }
 0x313   : >> { %2483 = vst [vmem:[%s3310_s30 + $0x40] sm:$0xff] %v2482_v55  ;;  %v2488_v26 = vld [vmem:[%s3314_s16 + $0x58] sm:$0xff]  ;;  %2485 = vst [vmem:[%s3310_s30 + $0x48] sm:$0xff] %v2484_v62  ;;  %v2490_v20 = vld [vmem:[%s3314_s16 + $0x60] sm:$0xff] }
 0x314   : >> { %2487 = vst [vmem:[%s3310_s30 + $0x50] sm:$0xff] %v2486_v3  ;;  %2489 = vst [vmem:[%s3310_s30 + $0x58] sm:$0xff] %v2488_v26  ;;  %v2492_v46 = vld [vmem:[%s3314_s16 + $0x68] sm:$0xff]  ;;  %v2494_v28 = vld [vmem:[%s3314_s16 + $0x70] sm:$0xff]  ;;  %s4710_s17 = scalar_lea.vmem %s4510_s22, %s2545_s15 [#allocation2]   ;;  %s4713_s18 = scalar_lea.vmem %s4631_s26, %s2545_s15  }
 0x315   : >> { %2491 = vst [vmem:[%s3310_s30 + $0x60] sm:$0xff] %v2490_v20  ;;  %2493 = vst [vmem:[%s3310_s30 + $0x68] sm:$0xff] %v2492_v46  ;;  %v2496_v10 = vld [vmem:[%s3314_s16 + $0x78] sm:$0xff]  ;;  %v2498_v19 = vld [vmem:[%s3314_s16 + $0x80] sm:$0xff] }
 0x316   : >> { %2495 = vst [vmem:[%s3310_s30 + $0x70] sm:$0xff] %v2494_v28  ;;  %v2500_v22 = vld [vmem:[%s3314_s16 + $0x88] sm:$0xff]  ;;  %2497 = vst [vmem:[%s3310_s30 + $0x78] sm:$0xff] %v2496_v10  ;;  %v2502_v0 = vld [vmem:[%s3314_s16 + $0x90] sm:$0xff] }
 0x317   : >> { %2499 = vst [vmem:[%s3310_s30 + $0x80] sm:$0xff] %v2498_v19  ;;  %2501 = vst [vmem:[%s3310_s30 + $0x88] sm:$0xff] %v2500_v22  ;;  %v2504_v61 = vld [vmem:[%s3314_s16 + $0x98] sm:$0xff]  ;;  %v2506_v13 = vld [vmem:[%s3314_s16 + $0xa0] sm:$0xff] }
 0x318   : >> { %2503 = vst [vmem:[%s3310_s30 + $0x90] sm:$0xff] %v2502_v0  ;;  %2505 = vst [vmem:[%s3310_s30 + $0x98] sm:$0xff] %v2504_v61  ;;  %v2508_v17 = vld [vmem:[%s3314_s16 + $0xa8] sm:$0xff]  ;;  %v2510_v51 = vld [vmem:[%s3314_s16 + $0xb0] sm:$0xff] }
 0x319   : >> { %2507 = vst [vmem:[%s3310_s30 + $0xa0] sm:$0xff] %v2506_v13  ;;  %v2512_v2 = vld [vmem:[%s3314_s16 + $0xb8] sm:$0xff]  ;;  %2509 = vst [vmem:[%s3310_s30 + $0xa8] sm:$0xff] %v2508_v17  ;;  %v2514_v30 = vld [vmem:[%s3314_s16 + $0xc0] sm:$0xff] }
 0x31a   : >> { %2511 = vst [vmem:[%s3310_s30 + $0xb0] sm:$0xff] %v2510_v51  ;;  %2513 = vst [vmem:[%s3310_s30 + $0xb8] sm:$0xff] %v2512_v2  ;;  %v2516_v41 = vld [vmem:[%s3314_s16 + $0xc8] sm:$0xff]  ;;  %v2518_v52 = vld [vmem:[%s3314_s16 + $0xd0] sm:$0xff] }
 0x31b   : >> { %2515 = vst [vmem:[%s3310_s30 + $0xc0] sm:$0xff] %v2514_v30  ;;  %2517 = vst [vmem:[%s3310_s30 + $0xc8] sm:$0xff] %v2516_v41  ;;  %v2520_v44 = vld [vmem:[%s3314_s16 + $0xd8] sm:$0xff]  ;;  %v2522_v14 = vld [vmem:[%s3314_s16 + $0xe0] sm:$0xff]  ;;  %2462 = sbr.rel (!%p2459_p12) target bundleno = 782 (0x30e), region = 145 }
 0x31c   : >> { %2519 = vst [vmem:[%s3310_s30 + $0xd0] sm:$0xff] %v2518_v52  ;;  %v2524_v21 = vld [vmem:[%s3314_s16 + $0xe8] sm:$0xff]  ;;  %2521 = vst [vmem:[%s3310_s30 + $0xd8] sm:$0xff] %v2520_v44  ;;  %v2526_v23 = vld [vmem:[%s3314_s16 + $0xf0] sm:$0xff] }
 0x31d   : >> { %2523 = vst [vmem:[%s3310_s30 + $0xe0] sm:$0xff] %v2522_v14  ;;  %2525 = vst [vmem:[%s3310_s30 + $0xe8] sm:$0xff] %v2524_v21  ;;  %v2528_v15 = vld [vmem:[%s3314_s16 + $0xf8] sm:$0xff]  ;;  %v2530_v24 = vld [vmem:[%s3314_s16 + $0x100] sm:$0xff] }
 0x31e   : >> { %2527 = vst [vmem:[%s3310_s30 + $0xf0] sm:$0xff] %v2526_v23  ;;  %2529 = vst [vmem:[%s3310_s30 + $0xf8] sm:$0xff] %v2528_v15  ;;  %v2532_v11 = vld [vmem:[%s3314_s16 + $0x108] sm:$0xff]  ;;  %v2534_v43 = vld [vmem:[%s3314_s16 + $0x110] sm:$0xff] }
 0x31f   : >> { %2531 = vst [vmem:[%s3310_s30 + $0x100] sm:$0xff] %v2530_v24  ;;  %v2536_v45 = vld [vmem:[%s3314_s16 + $0x118] sm:$0xff]  ;;  %2533 = vst [vmem:[%s3310_s30 + $0x108] sm:$0xff] %v2532_v11  ;;  %v2538_v47 = vld [vmem:[%s3314_s16 + $0x120] sm:$0xff] }
 0x320   : >> { %2535 = vst [vmem:[%s3310_s30 + $0x110] sm:$0xff] %v2534_v43  ;;  %2537 = vst [vmem:[%s3310_s30 + $0x118] sm:$0xff] %v2536_v45  ;;  %v2540_v25 = vld [vmem:[%s3314_s16 + $0x128] sm:$0xff]  ;;  %s4814_s16 = smov %s4710_s17 }
 0x321   : >> { %2539 = vst [vmem:[%s3310_s30 + $0x120] sm:$0xff] %v2538_v47  ;;  %2541 = vst [vmem:[%s3310_s30 + $0x128] sm:$0xff] %v2540_v25  ;;  %s4813_s30 = smov %s4713_s18 }
 0x322 PF: > { %3250 = sdivrem.u32 %s4820_s27, 38 }
 0x323   : > { %s2817_s19 = smul.u32 304, %s4637_s13 }
 0x325   : > { %s2553_s20 = scalar_lea.vmem %s4510_s22, %s2817_s19 [#allocation2]   ;;  %s2555_s21 = scalar_lea.vmem %s4631_s26, %s2817_s19  }
 0x32b   : > { %s3251_s23 = spop.drf %3250 }
 0x32c   : > { %p2819_p13 = scmp.le.s32.totalorder %s3251_s23, 0 }
 0x32d   : > { %s3324_s24 = smov (!%p2819_p13), %s2555_s21   ;;  %s3328_s25 = smov (!%p2819_p13), %s2553_s20  }
 0x32e   : > { %2652 = sbr.rel (%p2819_p13) target bundleno = 831 (0x33f), region = 150  ;;  %s3332_s29 = smov (!%p2819_p13), 0  }
 0x32f   : > { %s3336_s15 = smov (!%p2819_p13), 0  }
 0x335 LB: >> { %v2565_v56 = vld [vmem:[%s3330_s25] sm:$0xff]  ;;  %s2567_s30 = sadd.s32 1, %s3334_s29  ;;  %s2559_s15 = sadd.s32 1, %s3338_s15   ;;  %s3338_s15 = sphi %s3336_s15, %s2559_s15   ;;  %s3334_s29 = sphi %s3332_s29, %s3333_s29   ;;  %s3330_s25 = sphi %s3328_s25, %s2572_s25   ;;  %s3326_s24 = sphi %s3324_s24, %s2573_s24  }
 0x336   : >> { %2566 = vst [vmem:[%s3326_s24] sm:$0xff] %v2565_v56  ;;  %p2568_p0 = scmp.ge.s32.totalorder %s2567_s30, %s3251_s23  ;;  %p2558_p1 = scmp.ge.s32.totalorder %s2559_s15, %s3251_s23 }
 0x338   : >> { %s4824_s30 = smov (%p2568_p0, %s2567_s30), 0  ;;  %2561 = sbr.rel (!%p2558_p1) target bundleno = 821 (0x335), region = 156 }
 0x339   : >> { %s2820_s22 = sshll.u32 %s4824_s30, 3  ;;  %s3333_s29 = smov %s4824_s30  }
 0x33a   : >> { %s2572_s25 = scalar_lea.vmem %s2553_s20, %s2820_s22 [#allocation2]   ;;  %s2573_s24 = scalar_lea.vmem %s2555_s21, %s2820_s22  }
 0x33f PF: > { %p15_p2 = scmp.ge.s32.totalorder %s3403_s9, 4   ;;  %s4816_s27 = smov %s3302_s28 }
 0x340   : > { %s4817_s28 = smov %s3411_s12  ;;  %s4818_s29 = smov %s3403_s9 }
 0x341   :  { %17 = sbr.rel (!%p15_p2) target bundleno = 2 (0x2), region = 167 }

</bundles_post_ra>
